<compile_context>
chip_gen: v5e
topology: v5e:2x2
jax: 0.10.0
libtpu: 0.0.40
codegen_flags: <defaults>
</compile_context>

<pallas_src>
import jax
import jax.numpy as jnp
import numpy as np
from jax import lax
from jax.experimental import pallas as pl
from jax.experimental.pallas import tpu as pltpu

# ----- model hyper-parameters (small, consistent with the module) -----
B = 2             # batch
N = 8             # sequence length (tokens)
C = 32            # embedding dim
NUM_HEADS = 4
HEAD_DIM = C // NUM_HEADS
SCALE = HEAD_DIM ** (-0.5)
BN = B * N        # batch folded into rows
DH = 2 * HEAD_DIM + C          # per-head fused output width: [ q | k | V@W_proj ]

# Matmul-operand dtype.  bf16 is MXU-native on all generations and halves operand
# bytes (review); kept f32 here (with HIGHEST precision) for a tight numerics check.
MATMUL_DTYPE = jnp.float32
_PRECISION = lax.Precision.HIGHEST


def attention_kernel(x_ref, w_ref, mask_ref, b_ref, o_ref):
    """Whole (tiny) problem resident in VMEM; single invocation, no grid."""
    x = x_ref[...]                                    # (B*N, C)
    w = w_ref[...]                                    # (H, C, DH) per-head fused weights

    # One batched projection over heads: (H, B*N, DH) = [q | k | V@W_proj] per head.
    xb = jnp.broadcast_to(x, (NUM_HEADS,) + x.shape)  # hoisted once, tiny
    qkv = lax.dot_general(
        xb, w, (((2,), (1,)), ((0,), (0,))),
        preferred_element_type=jnp.float32, precision=_PRECISION)

    q = qkv[:, :, :HEAD_DIM]                          # (H, B*N, hd)  SCALE pre-folded
    k = qkv[:, :, HEAD_DIM:2 * HEAD_DIM]              # (H, B*N, hd)
    vp = qkv[:, :, 2 * HEAD_DIM:]                     # (H, B*N, C)   W_proj pre-folded

    # Scores: ONE batched NT contraction over all heads (no k^T materialized).
    s = lax.dot_general(
        q, k, (((2,), (2,)), ((0,), (0,))),
        preferred_element_type=jnp.float32, precision=_PRECISION)  # (H, B*N, B*N)
    # Block-diagonal additive mask keeps tokens from attending across batch rows.
    s = s + mask_ref[...]

    # One vectorized softmax over all heads (2 lane reductions total), exact denom.
    s = s - jnp.max(s, axis=-1, keepdims=True)
    p = jnp.exp(s)
    p = p / jnp.sum(p, axis=-1, keepdims=True)

    # P @ (V W_proj) batched over heads; summing the heads IS the output projection.
    ctx = lax.dot_general(
        p, vp, (((2,), (1,)), ((0,), (0,))),
        preferred_element_type=jnp.float32, precision=_PRECISION)  # (H, B*N, C)
    out = jnp.sum(ctx, axis=0) + b_ref[...]
    o_ref[...] = out.astype(o_ref.dtype)
    # TODO(synk): attn_drop / proj_drop omitted — dropout ratios are 0.0 => identity.


# Advisory cost estimate (helps XLA schedule around this micro-kernel).
_FLOPS = (2 * NUM_HEADS * BN * C * DH              # fused qkv(+proj) projection
          + 2 * NUM_HEADS * BN * BN * HEAD_DIM     # q @ k^T
          + 2 * NUM_HEADS * BN * BN * C)           # p @ (v W_proj)
_TRANSCENDENTALS = NUM_HEADS * BN * BN             # exp in softmax
_BYTES = 4 * (BN * C + NUM_HEADS * C * DH + BN * BN + C + BN * C)


@jax.jit
def attention_pallas(x, w_qkv, w_proj, b_proj):
    Bx, Nx, Cx = x.shape
    hd = Cx // NUM_HEADS

    # ---- wrapper-side algebraic folding (tiny one-off ops) ----
    # out = sum_h P_h (x W_v,h) W_proj[h] + b == sum_h P_h (x (W_v,h W_proj[h])) + b
    w_q = w_qkv[:, :Cx] * SCALE
    w_k = w_qkv[:, Cx:2 * Cx]
    w_v = w_qkv[:, 2 * Cx:]
    head_blocks = []
    for h in range(NUM_HEADS):
        s0 = h * hd
        w_vp = jnp.dot(w_v[:, s0:s0 + hd], w_proj[s0:s0 + hd, :], precision=_PRECISION)
        head_blocks.append(jnp.concatenate(
            [w_q[:, s0:s0 + hd], w_k[:, s0:s0 + hd], w_vp], axis=1))   # (C, DH)
    w_heads = jnp.stack(head_blocks, axis=0)                            # (H, C, DH)

    # Fold batch into token rows; cross-batch attention disabled by a block-diag mask
    # so all heads run as one batched matmul/softmax instead of B*H unrolled tiles.
    x_flat = x.reshape(Bx * Nx, Cx)
    row_batch = jnp.arange(Bx * Nx, dtype=jnp.int32) // Nx
    mask = jnp.where(row_batch[:, None] == row_batch[None, :],
                     0.0, -1e30).astype(jnp.float32)                    # (B*N, B*N)

    out_flat = pl.pallas_call(
        attention_kernel,
        out_shape=jax.ShapeDtypeStruct((Bx * Nx, Cx), x.dtype),
        # Degenerate grid dropped (review): whole arrays resident in VMEM, no pipeline
        # bookkeeping or double buffering for a single-step micro-problem.
        in_specs=[
            pl.BlockSpec(memory_space=pltpu.MemorySpace.VMEM),   # x (folded rows)
            pl.BlockSpec(memory_space=pltpu.MemorySpace.VMEM),   # per-head fused weights
            pl.BlockSpec(memory_space=pltpu.MemorySpace.VMEM),   # block-diag mask
            pl.BlockSpec(memory_space=pltpu.MemorySpace.VMEM),   # proj bias
        ],
        out_specs=pl.BlockSpec(memory_space=pltpu.MemorySpace.VMEM),
        cost_estimate=pl.CostEstimate(
            flops=_FLOPS, transcendentals=_TRANSCENDENTALS, bytes_accessed=_BYTES),
    )(x_flat.astype(MATMUL_DTYPE), w_heads.astype(MATMUL_DTYPE), mask, b_proj)

    # TODO(synk): at real ViT sizes (N~197+, C>=768) re-tile with a "parallel" grid over
    # tokens/heads so v7x's 64 MiB VMEM and its 2 TensorCores are respected.
    return out_flat.reshape(Bx, Nx, Cx)


def attention_reference(x, w_qkv, w_proj, b_proj):
    """Pure-JAX reference mirroring the PyTorch forward (full f32 precision)."""
    Bq, Nq, Cq = x.shape
    hd = Cq // NUM_HEADS
    qkv = jnp.einsum("bnc,cd->bnd", x, w_qkv, precision=_PRECISION)      # (B, N, 3C)
    qkv = qkv.reshape(Bq, Nq, 3, NUM_HEADS, hd)
    qkv = jnp.transpose(qkv, (2, 0, 3, 1, 4))                            # (3, B, H, N, hd)
    q, k, v = qkv[0], qkv[1], qkv[2]
    attn = jnp.einsum("bhqd,bhkd->bhqk", q, k, precision=_PRECISION) * SCALE
    attn = jax.nn.softmax(attn, axis=-1)
    o = jnp.einsum("bhqk,bhkd->bhqd", attn, v, precision=_PRECISION)     # (B, H, N, hd)
    o = jnp.transpose(o, (0, 2, 1, 3)).reshape(Bq, Nq, Cq)
    return jnp.einsum("bnc,cd->bnd", o, w_proj, precision=_PRECISION) + b_proj.reshape(1, 1, Cq)


if __name__ == "__main__":
    key = jax.random.PRNGKey(0)
    kx, kqkv, kproj, kb = jax.random.split(key, 4)

    x = jax.random.normal(kx, (B, N, C), dtype=jnp.float32)
    # deterministic synthetic parameters (nn.Linear-shaped, pre-transposed)
    w_qkv = jax.random.normal(kqkv, (C, 3 * C), dtype=jnp.float32) * (1.0 / np.sqrt(C))
    w_proj = jax.random.normal(kproj, (C, C), dtype=jnp.float32) * (1.0 / np.sqrt(C))
    b_proj = jax.random.normal(kb, (1, C), dtype=jnp.float32) * 0.01

    out = jax.block_until_ready(attention_pallas(x, w_qkv, w_proj, b_proj))
    ref = attention_reference(x, w_qkv, w_proj, b_proj)

    np.testing.assert_allclose(np.asarray(out), np.asarray(ref), rtol=1e-3, atol=1e-3)
    print("KERNEL_OK")
</pallas_src>

<mosaic_0001>
module attributes {stable_mosaic.version = 11 : i64} {
  func.func @attention_kernel(%arg0: memref<16x32xf32, #tpu.memory_space<vmem>>, %arg1: memref<4x32x48xf32, #tpu.memory_space<vmem>>, %arg2: memref<16x16xf32, #tpu.memory_space<vmem>>, %arg3: memref<1x32xf32, #tpu.memory_space<vmem>>, %arg4: memref<16x32xf32, #tpu.memory_space<vmem>>) attributes {dimension_semantics = [], scalar_prefetch = 0 : i64, scratch_operands = 0 : i64, tpu.core_type = #tpu.core_type<tc>} {
    %c0 = arith.constant 0 : index
    %c0_0 = arith.constant 0 : index
    %0 = vector.load %arg0[%c0, %c0_0] : memref<16x32xf32, #tpu.memory_space<vmem>>, vector<16x32xf32>
    %c0_1 = arith.constant 0 : index
    %c0_2 = arith.constant 0 : index
    %c0_3 = arith.constant 0 : index
    %1 = vector.load %arg1[%c0_1, %c0_2, %c0_3] : memref<4x32x48xf32, #tpu.memory_space<vmem>>, vector<4x32x48xf32>
    %2 = vector.shape_cast %0 : vector<16x32xf32> to vector<1x16x32xf32>
    %3 = vector.broadcast %2 : vector<1x16x32xf32> to vector<4x16x32xf32>
    %cst = arith.constant dense<0.000000e+00> : vector<4x16x48xf32>
    %4 = tpu.matmul %3, %1, %cst {dimension_numbers = #tpu.dot_dimension_numbers<[2], [1], [1], [2], [0, 0, 0, 1, 1, 2], [0], [0]>, precision = #tpu.contract_precision<fp32>} : vector<4x16x32xf32>, vector<4x32x48xf32>, vector<4x16x48xf32> -> vector<4x16x48xf32>
    %5 = vector.extract_strided_slice %4 {offsets = [0, 0, 0], sizes = [4, 16, 8], strides = [1, 1, 1]} : vector<4x16x48xf32> to vector<4x16x8xf32>
    %6 = vector.extract_strided_slice %4 {offsets = [0, 0, 8], sizes = [4, 16, 8], strides = [1, 1, 1]} : vector<4x16x48xf32> to vector<4x16x8xf32>
    %7 = vector.extract_strided_slice %4 {offsets = [0, 0, 16], sizes = [4, 16, 32], strides = [1, 1, 1]} : vector<4x16x48xf32> to vector<4x16x32xf32>
    %cst_4 = arith.constant dense<0.000000e+00> : vector<4x16x16xf32>
    %8 = tpu.matmul %5, %6, %cst_4 {dimension_numbers = #tpu.dot_dimension_numbers<[2], [2], [1], [1], [0, 0, 0, 1, 1, 1], [0], [0]>, precision = #tpu.contract_precision<fp32>} : vector<4x16x8xf32>, vector<4x16x8xf32>, vector<4x16x16xf32> -> vector<4x16x16xf32>
    %c0_5 = arith.constant 0 : index
    %c0_6 = arith.constant 0 : index
    %9 = vector.load %arg2[%c0_5, %c0_6] : memref<16x16xf32, #tpu.memory_space<vmem>>, vector<16x16xf32>
    %10 = vector.shape_cast %9 : vector<16x16xf32> to vector<1x16x16xf32>
    %11 = vector.broadcast %10 : vector<1x16x16xf32> to vector<4x16x16xf32>
    %12 = arith.addf %8, %11 : vector<4x16x16xf32>
    %cst_7 = arith.constant dense<0xFF800000> : vector<4x16xf32>
    %13 = vector.multi_reduction <maximumf>, %12, %cst_7 [2] : vector<4x16x16xf32> to vector<4x16xf32>
    %14 = vector.shape_cast %13 : vector<4x16xf32> to vector<4x16x1xf32>
    %15 = vector.broadcast %14 : vector<4x16x1xf32> to vector<4x16x16xf32>
    %16 = arith.subf %12, %15 : vector<4x16x16xf32>
    %17 = math.exp %16 : vector<4x16x16xf32>
    %cst_8 = arith.constant dense<0.000000e+00> : vector<4x16xf32>
    %18 = vector.multi_reduction <add>, %17, %cst_8 [2] : vector<4x16x16xf32> to vector<4x16xf32>
    %19 = vector.shape_cast %18 : vector<4x16xf32> to vector<4x16x1xf32>
    %20 = vector.broadcast %19 : vector<4x16x1xf32> to vector<4x16x16xf32>
    %21 = arith.divf %17, %20 : vector<4x16x16xf32>
    %cst_9 = arith.constant dense<0.000000e+00> : vector<4x16x32xf32>
    %22 = tpu.matmul %21, %7, %cst_9 {dimension_numbers = #tpu.dot_dimension_numbers<[2], [1], [1], [2], [0, 0, 0, 1, 1, 2], [0], [0]>, precision = #tpu.contract_precision<fp32>} : vector<4x16x16xf32>, vector<4x16x32xf32>, vector<4x16x32xf32> -> vector<4x16x32xf32>
    %cst_10 = arith.constant dense<0.000000e+00> : vector<16x32xf32>
    %23 = vector.multi_reduction <add>, %22, %cst_10 [0] : vector<4x16x32xf32> to vector<16x32xf32>
    %c0_11 = arith.constant 0 : index
    %c0_12 = arith.constant 0 : index
    %24 = vector.load %arg3[%c0_11, %c0_12] : memref<1x32xf32, #tpu.memory_space<vmem>>, vector<1x32xf32>
    %25 = vector.broadcast %24 : vector<1x32xf32> to vector<16x32xf32>
    %26 = arith.addf %23, %25 : vector<16x32xf32>
    %c0_13 = arith.constant 0 : index
    %c0_14 = arith.constant 0 : index
    %27 = vector.load %arg4[%c0_13, %c0_14] : memref<16x32xf32, #tpu.memory_space<vmem>>, vector<16x32xf32>
    tpu.vector_store %arg4[%c0_13, %c0_14], %26 {strides = array<i32>} : memref<16x32xf32, #tpu.memory_space<vmem>>, vector<16x32xf32>,
    return
  }
}

</mosaic_0001>

<bundles_post_ra>
// kernel: attention_pallas.1
= control target key start
LH: loop header
LB: loop body
LE: loop exit
PB: predicated region body
PF: predicated region fallthrough
CT: control target
= control target key end

     0   :  { %vm36_vm0 = vcmask 261120   ;;  %s3498_s0 = inlined_call_operand.vmem [shape: f32[16,32], index: 0, kind: input, shape index: {}]   ;;  %s3499_s1 = inlined_call_operand.vmem [shape: f32[4,32,48], index: 1, kind: input, shape index: {}]   ;;  %s3500_s2 = inlined_call_operand.vmem [shape: f32[16,16], index: 2, kind: input, shape index: {}]   ;;  %s3501_s3 = inlined_call_operand.vmem [shape: f32[1,32], index: 3, kind: input, shape index: {}]   ;;  %s3502_s4 = inlined_call_operand.hbm [shape: f32[16,32], index: 4, kind: output, shape index: {}]  }
   0x1   :  { %v23_v0 = vld [vmem:[%s3499_s1 + $0x18] sm:$0xff]  ;;  %v22_v1 = vld [vmem:[%s3499_s1 + $0x10] sm:$0xff]  ;;  %v21_v2 = vld [vmem:[%s3499_s1 + $0x8] sm:$0xff] }
   0x2   :  { %v2870_v3 = vand.u32 4294901760, %v23_v0  ;;  %v2872_v4 = vand.u32 4294901760, %v22_v1  ;;  %v2874_v5 = vand.u32 4294901760, %v21_v2  ;;  %v20_v6 = vld [vmem:[%s3499_s1] sm:$0xff]  ;;  %v19_v8 = vld [vmem:[%s3498_s0 + $0x8] sm:$0xff]  ;;  %v27_v12 = vld [vmem:[%s3499_s1 + $0x38] sm:$0xff] }
   0x3   :  { %v18_v7 = vld [vmem:[%s3498_s0] sm:$0xff]  ;;  %v2885_v9 = vand.u32 4294901760, %v20_v6  ;;  %v41_v11 = vsel %vm36_vm0, %v19_v8, 0  ;;  %v26_v13 = vld [vmem:[%s3499_s1 + $0x30] sm:$0xff] }
   0x4   :  { %v38_v10 = vsel %vm36_vm0, %v18_v7, 0  ;;  %56 = vmatpush.msra.mxu0 %v2870_v3  ;;  %v93_v14 = vsub.f32 %v23_v0, %v2870_v3  ;;  %173 = vmatpush.msra.mxu3 %v2870_v3  ;;  %v99_v15 = vsub.f32 %v22_v1, %v2872_v4  ;;  %v105_v16 = vsub.f32 %v21_v2, %v2874_v5 }
   0x5   :  { %v2900_v17 = vand.u32 4294901760, %v38_v10 }
   0x6   :  { %9 = vsyncpa [#allocation3], 0  ;;  %v2903_v18 = vsub.f32 %v20_v6, %v2885_v9  ;;  %v2905_v19 = vand.u32 4294901760, %v41_v11  ;;  %v2907_v20 = vand.u32 4294901760, %v27_v12  ;;  %v2909_v21 = vand.u32 4294901760, %v26_v13  ;;  %58 = vmatpush.msra.mxu0 %v2872_v4  ;;  %139 = vmatpush.msra.mxu2 %v93_v14  ;;  %v25_v37 = vld [vmem:[%s3499_s1 + $0x28] sm:$0xff] }
   0x7   :  { %v94_v22 = vand.u32 4294901760, %v93_v14  ;;  %v2913_v23 = vsub.f32 %v38_v10, %v2900_v17  ;;  %v100_v24 = vand.u32 4294901760, %v99_v15  ;;  %v106_v25 = vand.u32 4294901760, %v105_v16  ;;  %175 = vmatpush.msra.mxu3 %v2872_v4  ;;  %v24_v38 = vld [vmem:[%s3499_s1 + $0x20] sm:$0xff]  ;;  %v31_v60 = vld [vmem:[%s3499_s1 + $0x58] sm:$0xff]  ;;  %v30_v0 = vld [vmem:[%s3499_s1 + $0x50] sm:$0xff] }
   0x8   :  { %v112_v26 = vand.u32 4294901760, %v2903_v18  ;;  %v2918_v27 = vsub.f32 %v41_v11, %v2905_v19  ;;  %v2921_v28 = vsub.f32 %v27_v12, %v2907_v20  ;;  %v2924_v29 = vsub.f32 %v26_v13, %v2909_v21  ;;  %60 = vmatpush.msra.mxu0 %v2874_v5  ;;  %142 = vmatpush.msra.mxu2 %v99_v15  ;;  %v29_v2 = vld [vmem:[%s3499_s1 + $0x48] sm:$0xff]  ;;  %v28_v7 = vld [vmem:[%s3499_s1 + $0x40] sm:$0xff]  ;;  %s2832_s24 = smov 112   ;;  %s2755_s6 = sshll.u32 %s3502_s4, 4  ;;  %s2756_s6 = int_to_ptr.hbm [resolvable:$true] %s2755_s6 }
   0x9   :  { %v95_v30 = vsub.f32 %v93_v14, %v94_v22  ;;  %v2928_v31 = vand.u32 4294901760, %v2913_v23  ;;  %v101_v32 = vsub.f32 %v99_v15, %v100_v24  ;;  %v107_v33 = vsub.f32 %v105_v16, %v106_v25  ;;  %177 = vmatpush.msra.mxu3 %v2874_v5  ;;  %v35_v14 = vld [vmem:[%s3499_s1 + $0x78] sm:$0xff]  ;;  %s2834_s7 = smov 128   ;;  %s2835_s8 = smov 8  }
   0xa   :  { %v113_v34 = vsub.f32 %v2903_v18, %v112_v26  ;;  %v310_v35 = vand.u32 4294901760, %v2921_v28  ;;  %v316_v36 = vand.u32 4294901760, %v2924_v29  ;;  %62 = vmatpush.msra.mxu0 %v2885_v9  ;;  %145 = vmatpush.msra.mxu2 %v105_v16  ;;  %v2944_v42 = vand.u32 4294901760, %v2918_v27 }
   0xb   :  { %v96_v39 = vand.u32 4294901760, %v95_v30  ;;  %v66_v40 = vsub.f32 %v2913_v23, %v2928_v31  ;;  %v102_v41 = vand.u32 4294901760, %v101_v32  ;;  %179 = vmatpush.msra.mxu3 %v2885_v9  ;;  %v108_v46 = vand.u32 4294901760, %v107_v33  ;;  %v32_v33 = vld [vmem:[%s3499_s1 + $0x60] sm:$0xff] }
   0xc   :  { %208 = vmatpush.msrb.mxu0 %v94_v22  ;;  %v311_v43 = vsub.f32 %v2921_v28, %v310_v35  ;;  %v317_v44 = vsub.f32 %v2924_v29, %v316_v36  ;;  %148 = vmatpush.msra.mxu2 %v2903_v18  ;;  %v2956_v47 = vand.u32 4294901760, %v25_v37  ;;  %v2958_v48 = vand.u32 4294901760, %v24_v38  ;;  %v34_v18 = vld [vmem:[%s3499_s1 + $0x70] sm:$0xff] }
   0xd   :  { %97 = vmatpush.msra.mxu1 %v96_v39  ;;  %v2953_v45 = vand.u32 4294901760, %v66_v40  ;;  %151 = vmatmul.f32.vlgmr.msra.gmra.mxu2 %v2913_v23  ;;  %v114_v49 = vand.u32 4294901760, %v113_v34  ;;  %v74_v51 = vsub.f32 %v2918_v27, %v2944_v42  ;;  %v2977_v63 = vand.u32 4294901760, %v31_v60 }
   0xe   :  { %183 = vmatmul.f32.vlgmr.msra.gmra.mxu3 %v2928_v31  ;;  %v312_v50 = vand.u32 4294901760, %v311_v43  ;;  %v318_v52 = vand.u32 4294901760, %v317_v44  ;;  %v321_v53 = vsub.f32 %v25_v37, %v2956_v47  ;;  %v327_v54 = vsub.f32 %v24_v38, %v2958_v48  ;;  %272 = vmatpush.msrb.mxu2 %v2907_v20 }
   0xf   :  { %68 = vmatmul.f32.vlgmr.msra.gmra.mxu0 %v2953_v45  ;;  %103 = vmatpush.msra.mxu1 %v102_v41  ;;  %v2969_v57 = vand.u32 4294901760, %v74_v51  ;;  %v2985_v1 = vand.u32 4294901760, %v30_v0  ;;  %v2996_v6 = vand.u32 4294901760, %v29_v2  ;;  %v3012_v8 = vand.u32 4294901760, %v28_v7 }
  0x10   :  { %212 = vmatpush.msrb.mxu0 %v100_v24  ;;  %313 = vmatpush.msrb.mxu3 %v312_v50  ;;  %v322_v55 = vand.u32 4294901760, %v321_v53  ;;  %v328_v56 = vand.u32 4294901760, %v327_v54  ;;  %v3037_v15 = vand.u32 4294901760, %v35_v14  ;;  %v3053_v22 = vand.u32 4294901760, %v34_v18 }
  0x11   :  { %109 = vmatpush.msra.mxu1 %v108_v46  ;;  %274 = vmatpush.msrb.mxu2 %v2909_v21  ;;  %v3017_v10 = vsub.f32 %v29_v2, %v2996_v6  ;;  %vm915_vm1 = vcmask 64512   ;;  %vm1726_vm2 = vcmask 130048  }
  0x12   :  { %216 = vmatpush.msrb.mxu0 %v106_v25  ;;  %319 = vmatpush.msrb.mxu3 %v318_v52  ;;  %v323_v58 = vsub.f32 %v321_v53, %v322_v55  ;;  %v329_v59 = vsub.f32 %v327_v54, %v328_v56  ;;  %v3069_v30 = vsub.f32 %v34_v18, %v3053_v22 }
  0x13   :  { %115 = vmatpush.msra.mxu1 %v114_v49  ;;  %276 = vmatpush.msrb.mxu2 %v2956_v47  ;;  %v538_v13 = vand.u32 4294901760, %v3017_v10 }
  0x14   :  { %117 = vmatmul.f32.vlgmr.msra.gmra.mxu1 %v2900_v17  ;;  %220 = vmatpush.msrb.mxu0 %v112_v26  ;;  %v324_v61 = vand.u32 4294901760, %v323_v58  ;;  %v330_v62 = vand.u32 4294901760, %v329_v59  ;;  %v33_v26 = vld [vmem:[%s3499_s1 + $0x68] sm:$0xff]  ;;  %s2831_s1 = smov 120  }
  0x15   :  { %243 = vmatpush.msrb.mxu1 %v2870_v3  ;;  %156 = vmatmul.f32.gmra.mxu2 %v2918_v27  ;;  %v2994_v3 = vsub.f32 %v31_v60, %v2977_v63  ;;  %v539_v25 = vsub.f32 %v3017_v10, %v538_v13 }
  0x16   :  { %189 = vmatmul.f32.gmra.mxu3 %v2944_v42  ;;  %278 = vmatpush.msrb.mxu2 %v2958_v48 }
  0x17   :  { %76 = vmatmul.f32.gmra.mxu0 %v2969_v57  ;;  %325 = vmatpush.msrb.mxu3 %v324_v61  ;;  %v540_v37 = vand.u32 4294901760, %v539_v25 }
  0x18   :  { %245 = vmatpush.msrb.mxu1 %v2872_v4  ;;  %355 = vmatpush.msra.mxu0 %v2921_v28  ;;  %v3007_v4 = vsub.f32 %v30_v0, %v2985_v1 }
  0x19   :  { %331 = vmatpush.msrb.mxu3 %v330_v62  ;;  %424 = vmatpush.msra.mxu2 %v310_v35  ;;  %v748_v35 = vand.u32 4294901760, %v3069_v30 }
  0x1a   :  { %247 = vmatpush.msrb.mxu1 %v2874_v5  ;;  %358 = vmatpush.msra.mxu0 %v2924_v29  ;;  %v526_v5 = vand.u32 4294901760, %v2994_v3  ;;  %v532_v11 = vand.u32 4294901760, %v3007_v4  ;;  %v3066_v29 = vand.u32 4294901760, %v33_v26 }
  0x1b   :  { %459 = vmatpush.msra.mxu3 %v2907_v20  ;;  %428 = vmatpush.msra.mxu2 %v316_v36  ;;  %v3082_v36 = vand.u32 4294901760, %v32_v33  ;;  %v749_v40 = vsub.f32 %v3069_v30, %v748_v35 }
  0x1c   :  { %121 = vmatmul.f32.gmra.mxu1 %v2905_v19  ;;  %361 = vmatpush.msra.mxu0 %v321_v53  ;;  %v527_v12 = vsub.f32 %v2994_v3, %v526_v5  ;;  %v533_v16 = vsub.f32 %v3007_v4, %v532_v11  ;;  %v753_v39 = vsub.f32 %v33_v26, %v3066_v29 }
  0x1d   :  { %249 = vmatpush.msrb.mxu1 %v2885_v9  ;;  %284 = vmatmul.f32.vlgmr.msrb.gmra.mxu2 %v2953_v45  ;;  %v3025_v9 = vsub.f32 %v28_v7, %v3012_v8  ;;  %v759_v41 = vsub.f32 %v32_v33, %v3082_v36 }
  0x1e   :  { %333 = vmatmul.f32.vlgmr.msrb.gmra.mxu3 %v2900_v17  ;;  %364 = vmatpush.msra.mxu0 %v327_v54  ;;  %v528_v24 = vand.u32 4294901760, %v527_v12  ;;  %v534_v32 = vand.u32 4294901760, %v533_v16  ;;  %v754_v46 = vand.u32 4294901760, %v753_v39 }
  0x1f   :  { %222 = vmatmul.f32.vlgmr.msrb.gmra.mxu0 %v2900_v17  ;;  %389 = vmatpush.msra.mxu1 %v2907_v20  ;;  %v544_v20 = vand.u32 4294901760, %v3025_v9 }
  0x20   :  { %432 = vmatpush.msra.mxu2 %v322_v55  ;;  %461 = vmatpush.msra.mxu3 %v2909_v21  ;;  %v755_v49 = vsub.f32 %v753_v39, %v754_v46 }
  0x21   :  { %391 = vmatpush.msra.mxu1 %v2909_v21  ;;  %488 = vmatpush.msrb.mxu0 %v2977_v63  ;;  %v3051_v21 = vsub.f32 %v35_v14, %v3037_v15  ;;  %v545_v34 = vsub.f32 %v3025_v9, %v544_v20 }
  0x22   :  { %436 = vmatpush.msra.mxu2 %v328_v56  ;;  %463 = vmatpush.msra.mxu3 %v2956_v47  ;;  %v756_v51 = vand.u32 4294901760, %v755_v49 }
  0x23   :  { %393 = vmatpush.msra.mxu1 %v2956_v47  ;;  %490 = vmatpush.msrb.mxu0 %v2985_v1  ;;  %v742_v28 = vand.u32 4294901760, %v3051_v21  ;;  %v546_v43 = vand.u32 4294901760, %v545_v34  ;;  %v750_v47 = vand.u32 4294901760, %v749_v40 }
  0x24   :  { %251 = vmatmul.f32.vlgmr.msrb.gmra.mxu1 %v2900_v17  ;;  %465 = vmatpush.msra.mxu3 %v2958_v48 }
  0x25   :  { %395 = vmatpush.msra.mxu1 %v2958_v48  ;;  %292 = vmatmul.f32.gmra.mxu2 %v2969_v57  ;;  %v743_v38 = vsub.f32 %v3051_v21, %v742_v28  ;;  %v760_v48 = vand.u32 4294901760, %v759_v41 }
  0x26   :  { %337 = vmatmul.f32.gmra.mxu3 %v2905_v19  ;;  %571 = vmatpush.msrb.mxu2 %v2994_v3 }
  0x27   :  { %226 = vmatmul.f32.gmra.mxu0 %v2905_v19  ;;  %605 = vmatpush.msrb.mxu3 %v2977_v63  ;;  %v744_v44 = vand.u32 4294901760, %v743_v38  ;;  %v761_v50 = vsub.f32 %v759_v41, %v760_v48 }
  0x28   :  { %492 = vmatpush.msrb.mxu0 %v2996_v6  ;;  %574 = vmatpush.msrb.mxu2 %v3007_v4 }
  0x29   :  { %529 = vmatpush.msrb.mxu1 %v528_v24  ;;  %607 = vmatpush.msrb.mxu3 %v2985_v1  ;;  %v762_v52 = vand.u32 4294901760, %v761_v50 }
  0x2a   :  { %494 = vmatpush.msrb.mxu0 %v3012_v8  ;;  %577 = vmatpush.msrb.mxu2 %v3017_v10 }
  0x2b   :  { %535 = vmatpush.msrb.mxu1 %v534_v32  ;;  %609 = vmatpush.msrb.mxu3 %v2996_v6 }
  0x2c   :  { %255 = vmatmul.f32.gmra.mxu1 %v2905_v19  ;;  %580 = vmatpush.msrb.mxu2 %v3025_v9 }
  0x2d   :  { %541 = vmatpush.msrb.mxu1 %v540_v37  ;;  %438 = vmatmul.f32.vlgmr.msra.gmra.mxu2 %v2900_v17 }
  0x2e   :  { %467 = vmatmul.f32.vlgmr.msra.gmra.mxu3 %v2900_v17  ;;  %704 = vmatpush.msra.mxu2 %v3037_v15 }
  0x2f   :  { %367 = vmatmul.f32.vlgmr.msra.gmra.mxu0 %v2913_v23  ;;  %611 = vmatpush.msrb.mxu3 %v3012_v8 }
  0x30   :  { %547 = vmatpush.msrb.mxu1 %v546_v43  ;;  %640 = vmatpush.msra.mxu0 %v526_v5 }
  0x31   :  { %745 = vmatpush.msra.mxu3 %v744_v44  ;;  %706 = vmatpush.msra.mxu2 %v3053_v22 }
  0x32   :  { %644 = vmatpush.msra.mxu0 %v532_v11 }
  0x33   :  { %751 = vmatpush.msra.mxu3 %v750_v47  ;;  %708 = vmatpush.msra.mxu2 %v3066_v29 }
  0x34   :  { %399 = vmatmul.f32.vlgmr.msra.gmra.mxu1 %v2928_v31  ;;  %648 = vmatpush.msra.mxu0 %v538_v13 }
  0x35   :  { %675 = vmatpush.msra.mxu1 %v2977_v63  ;;  %442 = vmatmul.f32.gmra.mxu2 %v2905_v19 }
  0x36   :  { %471 = vmatmul.f32.gmra.mxu3 %v2905_v19  ;;  %652 = vmatpush.msra.mxu0 %v544_v20 }
  0x37   :  { %372 = vmatmul.f32.gmra.mxu0 %v2918_v27  ;;  %677 = vmatpush.msra.mxu1 %v2985_v1 }
  0x38   :  { %710 = vmatpush.msra.mxu2 %v3082_v36  ;;  %757 = vmatpush.msra.mxu3 %v756_v51 }
  0x39   :  { %679 = vmatpush.msra.mxu1 %v2996_v6 }
  0x3a   :  { %763 = vmatpush.msra.mxu3 %v762_v52 }
  0x3b   :  { %681 = vmatpush.msra.mxu1 %v3012_v8 }
  0x3c   :  { %405 = vmatmul.f32.gmra.mxu1 %v2944_v42 }
  0x3d   :  { %583 = vmatmul.f32.vlgmr.msrb.gmra.mxu2 %v2913_v23 }
  0x3e   :  { %615 = vmatmul.f32.vlgmr.msrb.gmra.mxu3 %v2928_v31  ;;  %856 = vmatpush.msrb.mxu2 %v742_v28 }
  0x3f   :  { %500 = vmatmul.f32.vlgmr.msrb.gmra.mxu0 %v2953_v45  ;;  %891 = vmatpush.msrb.mxu3 %v3037_v15 }
  0x40   :  { %787 = vmatpush.msrb.mxu0 %v3051_v21  ;;  %860 = vmatpush.msrb.mxu2 %v748_v35 }
  0x41   :  { %893 = vmatpush.msrb.mxu3 %v3053_v22 }
  0x42   :  { %790 = vmatpush.msrb.mxu0 %v3069_v30  ;;  %864 = vmatpush.msrb.mxu2 %v754_v46 }
  0x43   :  { %895 = vmatpush.msrb.mxu3 %v3066_v29 }
  0x44   :  { %549 = vmatmul.f32.vlgmr.msrb.gmra.mxu1 %v2900_v17  ;;  %793 = vmatpush.msrb.mxu0 %v753_v39 }
  0x45   :  { %821 = vmatpush.msrb.mxu1 %v3037_v15  ;;  %868 = vmatpush.msrb.mxu2 %v760_v48 }
  0x46   :  { %588 = vmatmul.f32.gmra.mxu2 %v2918_v27  ;;  %621 = vmatmul.f32.gmra.mxu3 %v2944_v42 }
  0x47   :  { %508 = vmatmul.f32.gmra.mxu0 %v2969_v57  ;;  %823 = vmatpush.msrb.mxu1 %v3053_v22 }
  0x48   :  { %796 = vmatpush.msrb.mxu0 %v759_v41  ;;  %897 = vmatpush.msrb.mxu3 %v3082_v36 }
  0x49   :  { %825 = vmatpush.msrb.mxu1 %v3066_v29 }
  0x4b   :  { %827 = vmatpush.msrb.mxu1 %v3082_v36 }
  0x4c   :  { %553 = vmatmul.f32.gmra.mxu1 %v2905_v19 }
  0x4e   :  { %716 = vmatmul.f32.vlgmr.msra.gmra.mxu2 %v2953_v45  ;;  %765 = vmatmul.f32.vlgmr.msra.gmra.mxu3 %v2900_v17 }
  0x4f   :  { %654 = vmatmul.f32.vlgmr.msra.gmra.mxu0 %v2900_v17 }
  0x54   :  { %683 = vmatmul.f32.vlgmr.msra.gmra.mxu1 %v2900_v17 }
  0x56   :  { %724 = vmatmul.f32.gmra.mxu2 %v2969_v57  ;;  %769 = vmatmul.f32.gmra.mxu3 %v2905_v19 }
  0x57   :  { %658 = vmatmul.f32.gmra.mxu0 %v2905_v19 }
  0x5c   :  { %687 = vmatmul.f32.gmra.mxu1 %v2905_v19 }
  0x5e   :  { %870 = vmatmul.f32.vlgmr.msrb.gmra.mxu2 %v2900_v17  ;;  %899 = vmatmul.f32.vlgmr.msrb.gmra.mxu3 %v2900_v17 }
  0x5f   :  { %799 = vmatmul.f32.vlgmr.msrb.gmra.mxu0 %v2913_v23 }
  0x64   :  { %831 = vmatmul.f32.vlgmr.msrb.gmra.mxu1 %v2928_v31 }
  0x66   :  { %874 = vmatmul.f32.gmra.mxu2 %v2905_v19  ;;  %903 = vmatmul.f32.gmra.mxu3 %v2905_v19 }
  0x67   :  { %804 = vmatmul.f32.gmra.mxu0 %v2918_v27 }
  0x6c   :  { %837 = vmatmul.f32.gmra.mxu1 %v2944_v42 }
  0x8c   :  { %v69_v45 = vpop.f32.mrf.mxu0 }
  0x90   :  { %v152_v54 = vpop.f32.mrf.mxu2 }
  0x91   :  { %v118_v53 = vpop.f32.mrf.mxu1  ;;  %v184_v55 = vpop.f32.mrf.mxu3 }
  0x92   :  { %v119_v19 = vadd.f32 %v118_v53, %v69_v45 }
  0x94   :  { %v77_v56 = vpop.f32.mrf.mxu0  ;;  %v153_v2 = vadd.f32 %v152_v54, %v119_v19 }
  0x96   :  { %v185_v4 = vadd.f32 %v184_v55, %v153_v2 }
  0x98   :  { %v157_v58 = vpop.f32.mrf.mxu2 }
  0x99   :  { %v122_v57 = vpop.f32.mrf.mxu1  ;;  %v190_v17 = vpop.f32.mrf.mxu3 }
  0x9a   :  { %v123_v23 = vadd.f32 %v122_v57, %v77_v56 }
  0x9c   :  { %v223_v59 = vpop.f32.mrf.mxu0  ;;  %v158_v61 = vadd.f32 %v157_v58, %v123_v23 }
  0x9d   :  { %v224_v8 = vadd.f32 %v223_v59, %v185_v4 }
  0x9e   :  { %v191_v0 = vadd.f32 %v190_v17, %v158_v61 }
  0xa0   :  { %v285_v31 = vpop.f32.mrf.mxu2 }
  0xa1   :  { %v252_v60 = vpop.f32.mrf.mxu1  ;;  %v334_v62 = vpop.f32.mrf.mxu3 }
  0xa2   :  { %v3162_v11 = vadd.f32 %v252_v60, %v224_v8  ;;  %v335_v18 = vadd.f32 %v334_v62, %v285_v31 }
  0xa4   :  { %v227_v63 = vpop.f32.mrf.mxu0  ;;  %v916_v8 = vsel %vm915_vm1, %v3162_v11, 0 }
  0xa5   :  { %v228_v27 = vadd.f32 %v227_v63, %v191_v0 }
  0xa8   :  { %v293_v42 = vpop.f32.mrf.mxu2 }
  0xa9   :  { %v256_v1 = vpop.f32.mrf.mxu1  ;;  %v338_v6 = vpop.f32.mrf.mxu3 }
  0xaa   :  { %v3158_v3 = vadd.f32 %v256_v1, %v228_v27  ;;  %v339_v13 = vadd.f32 %v338_v6, %v293_v42 }
  0xac   :  { %v368_v7 = vpop.f32.mrf.mxu0  ;;  %913 = vrot.lane.b32.xlu0 %v3158_v3, %s2831_s1 }
  0xad   :  { %v369_v22 = vadd.f32 %v368_v7, %v335_v18 }
  0xb0   :  { %v439_v10 = vpop.f32.mrf.mxu2 }
  0xb1   :  { %v400_v5 = vpop.f32.mrf.mxu1  ;;  %v468_v9 = vpop.f32.mrf.mxu3 }
  0xb2   :  { %v401_v26 = vadd.f32 %v400_v5, %v369_v22  ;;  %v3194_v5 = vand.u32 4294901760, %v916_v8 }
  0xb4   :  { %v373_v12 = vpop.f32.mrf.mxu0  ;;  %911 = vrot.lane.b32.xlu0 %v3162_v11, %s2831_s1  ;;  %v440_v32 = vadd.f32 %v439_v10, %v401_v26 }
  0xb5   :  { %v374_v14 = vadd.f32 %v373_v12, %v339_v13  ;;  %v918_v13 = vsel %vm915_vm1, %v3158_v3, 0 }
  0xb6   :  { %v3170_v35 = vadd.f32 %v468_v9, %v440_v32  ;;  %v943_v9 = vsub.f32 %v916_v8, %v3194_v5 }
  0xb8   :  { %v443_v16 = vpop.f32.mrf.mxu2  ;;  %v944_v18 = vand.u32 4294901760, %v943_v9 }
  0xb9   :  { %v406_v15 = vpop.f32.mrf.mxu1  ;;  %v472_v21 = vpop.f32.mrf.mxu3 }
  0xba   :  { %v407_v20 = vadd.f32 %v406_v15, %v374_v14 }
  0xbc   :  { %v444_v24 = vadd.f32 %v443_v16, %v407_v20  ;;  %v501_v25 = vpop.f32.mrf.mxu0  ;;  %v3200_v16 = vand.u32 4294901760, %v918_v13 }
  0xbe   :  { %v3166_v28 = vadd.f32 %v472_v21, %v444_v24  ;;  %v951_v26 = vsub.f32 %v918_v13, %v3200_v16 }
  0xc0   :  { %1118 = vrot.lane.b32.xlu1 %v3166_v28, %s2831_s1  ;;  %v584_v30 = vpop.f32.mrf.mxu2 }
  0xc1   :  { %v550_v29 = vpop.f32.mrf.mxu1  ;;  %v616_v33 = vpop.f32.mrf.mxu3 }
  0xc2   :  { %v551_v48 = vadd.f32 %v550_v29, %v501_v25  ;;  %v945_v25 = vsub.f32 %v943_v9, %v944_v18 }
  0xc4   :  { %v509_v34 = vpop.f32.mrf.mxu0  ;;  %v585_v45 = vadd.f32 %v584_v30, %v551_v48 }
  0xc6   :  { %v617_v56 = vadd.f32 %v616_v33, %v585_v45  ;;  %v952_v33 = vand.u32 4294901760, %v951_v26 }
  0xc8   :  { %1116 = vrot.lane.b32.xlu1 %v3170_v35, %s2831_s1 }
  0xc9   :  { %v554_v36 = vpop.f32.mrf.mxu1  ;;  %v589_v37 = vpop.f32.mrf.mxu2 }
  0xca   :  { %v622_v38 = vpop.f32.mrf.mxu3  ;;  %v555_v40 = vadd.f32 %v554_v36, %v509_v34  ;;  %v1120_v34 = vsel %vm915_vm1, %v3170_v35, 0 }
  0xcc   :  { %v655_v39 = vpop.f32.mrf.mxu0  ;;  %v590_v44 = vadd.f32 %v589_v37, %v555_v40 }
  0xcd   :  { %v656_v58 = vadd.f32 %v655_v39, %v617_v56  ;;  %v953_v39 = vsub.f32 %v951_v26, %v952_v33 }
  0xce   :  { %v623_v49 = vadd.f32 %v622_v38, %v590_v44  ;;  %v3206_v38 = vand.u32 4294901760, %v1120_v34 }
  0xd1   :  { %v684_v41 = vpop.f32.mrf.mxu1  ;;  %v717_v43 = vpop.f32.mrf.mxu2 }
  0xd2   :  { %v766_v46 = vpop.f32.mrf.mxu3  ;;  %v3178_v60 = vadd.f32 %v684_v41, %v656_v58 }
  0xd3   :  { %v767_v57 = vadd.f32 %v766_v46, %v717_v43  ;;  %v3209_v43 = vsub.f32 %v1120_v34, %v3206_v38  ;;  %v954_v46 = vand.u32 4294901760, %v953_v39 }
  0xd4   :  { %v659_v47 = vpop.f32.mrf.mxu0 }
  0xd5   :  { %v660_v50 = vadd.f32 %v659_v47, %v623_v49  ;;  %v1122_v47 = vsel %vm915_vm1, %v3166_v28, 0  ;;  %v1148_v45 = vand.u32 4294901760, %v3209_v43 }
  0xd9   :  { %v688_v51 = vpop.f32.mrf.mxu1  ;;  %v725_v52 = vpop.f32.mrf.mxu2 }
  0xda   :  { %v3174_v53 = vadd.f32 %v688_v51, %v660_v50  ;;  %v770_v54 = vpop.f32.mrf.mxu3  ;;  %v3215_v51 = vand.u32 4294901760, %v1122_v47 }
  0xdb   :  { %v771_v19 = vadd.f32 %v770_v54, %v725_v52 }
  0xdc   :  { %v800_v55 = vpop.f32.mrf.mxu0  ;;  %1322 = vrot.lane.b32.xlu2 %v3174_v53, %s2831_s1 }
  0xdd   :  { %v801_v17 = vadd.f32 %v800_v55, %v767_v57 }
  0xe1   :  { %v832_v59 = vpop.f32.mrf.mxu1  ;;  %v871_v23 = vpop.f32.mrf.mxu2 }
  0xe2   :  { %v833_v31 = vadd.f32 %v832_v59, %v801_v17  ;;  %v900_v61 = vpop.f32.mrf.mxu3  ;;  %v1149_v59 = vsub.f32 %v3209_v43, %v1148_v45 }
  0xe4   :  { %v872_v62 = vadd.f32 %v871_v23, %v833_v31  ;;  %1320 = vrot.lane.b32.xlu2 %v3178_v60, %s2831_s1  ;;  %v805_v63 = vpop.f32.mrf.mxu0  ;;  %v3227_v23 = vsub.f32 %v1122_v47, %v3215_v51 }
  0xe5   :  { %v806_v27 = vadd.f32 %v805_v63, %v771_v19 }
  0xe6   :  { %v3182_v0 = vadd.f32 %v900_v61, %v872_v62 }
  0xe8   :  { %1524 = vrot.lane.b32.xlu1 %v3182_v0, %s2831_s1 }
  0xe9   :  { %v838_v1 = vpop.f32.mrf.mxu1  ;;  %v875_v42 = vpop.f32.mrf.mxu2 }
  0xea   :  { %v839_v2 = vadd.f32 %v838_v1, %v806_v27  ;;  %v904_v6 = vpop.f32.mrf.mxu3  ;;  %v1150_v1 = vand.u32 4294901760, %v1149_v59 }
  0xec   :  { %v876_v7 = vadd.f32 %v875_v42, %v839_v2  ;;  %v1156_v42 = vand.u32 4294901760, %v3227_v23 }
  0xee   :  { %v3186_v4 = vadd.f32 %v904_v6, %v876_v7 }
  0xf0   :  { %1526 = vrot.lane.b32.xlu0 %v3186_v4, %s2831_s1 }
  0xf8   :  { %1921 = vrot.lane.b32.xlu0 %v3158_v3, %s2832_s24  ;;  %v946_v3 = vand.u32 4294901760, %v945_v25 }
 0x11e   :  { %v914_v10 = vpop.permute.xlu0 %913 }
 0x11f   :  { %v922_v12 = vsel %vm915_vm1, %v914_v10, 0 }
 0x120   :  { %v938_v14 = vand.u32 4294901760, %v922_v12 }
 0x122   :  { %v974_v15 = vsub.f32 %v922_v12, %v938_v14  ;;  %939 = vmatpush.xpose.msra.mxu0 %v938_v14  ;;  %1040 = vmatpush.xpose.msra.mxu3 %v938_v14 }
 0x124   :  { %v975_v20 = vand.u32 4294901760, %v974_v15  ;;  %1010 = vmatpush.xpose.msra.mxu2 %v974_v15 }
 0x126   :  { %v976_v21 = vsub.f32 %v974_v15, %v975_v20  ;;  %v912_v22 = vpop.permute.xlu0 %911 }
 0x127   :  { %v920_v24 = vsel %vm915_vm1, %v912_v22, 0 }
 0x128   :  { %v977_v29 = vand.u32 4294901760, %v976_v21  ;;  %v940_v30 = vand.u32 4294901760, %v920_v24  ;;  %v1324_v21 = vsel %vm915_vm1, %v3178_v60, 0 }
 0x129   :  { %v3240_v22 = vand.u32 4294901760, %v1324_v21 }
 0x12a   :  { %v980_v32 = vsub.f32 %v920_v24, %v940_v30  ;;  %941 = vmatpush.xpose.msra.mxu0 %v940_v30  ;;  %978 = vmatpush.xpose.msra.mxu1 %v977_v29  ;;  %v1326_v24 = vsel %vm915_vm1, %v3174_v53, 0 }
 0x12b   :  { %1042 = vmatpush.xpose.msra.mxu3 %v940_v30  ;;  %v3250_v25 = vand.u32 4294901760, %v1326_v24 }
 0x12c   :  { %1013 = vmatpush.xpose.msra.mxu2 %v980_v32  ;;  %v981_v36 = vand.u32 4294901760, %v980_v32 }
 0x12d   :  { %947 = vmatmul.f32.vlgmr.msra.gmra.mxu0 %v946_v3  ;;  %v1359_v29 = vsub.f32 %v1326_v24, %v3250_v25 }
 0x12e   :  { %1073 = vmatpush.xpose.msrb.mxu0 %v975_v20  ;;  %1046 = vmatmul.f32.vlgmr.msra.gmra.mxu3 %v944_v18  ;;  %v982_v37 = vsub.f32 %v980_v32, %v981_v36  ;;  %v1528_v32 = vsel %vm915_vm1, %v3182_v0, 0 }
 0x12f   :  { %1016 = vmatmul.f32.vlgmr.msra.gmra.mxu2 %v943_v9  ;;  %v1157_v9 = vsub.f32 %v3227_v23, %v1156_v42 }
 0x130   :  { %v983_v40 = vand.u32 4294901760, %v982_v37 }
 0x131   :  { %v1158_v18 = vand.u32 4294901760, %v1157_v9 }
 0x132   :  { %1077 = vmatpush.xpose.msrb.mxu0 %v981_v36  ;;  %v1119_v41 = vpop.permute.xlu1 %1118  ;;  %984 = vmatpush.xpose.msra.mxu1 %v983_v40  ;;  %v3262_v36 = vand.u32 4294901760, %v1528_v32 }
 0x133   :  { %v1126_v44 = vsel %vm915_vm1, %v1119_v41, 0 }
 0x134   :  { %v1142_v48 = vand.u32 4294901760, %v1126_v44 }
 0x135   :  { %955 = vmatmul.f32.gmra.mxu0 %v954_v46  ;;  %986 = vmatmul.f32.vlgmr.msra.gmra.mxu1 %v3194_v5 }
 0x136   :  { %1102 = vmatpush.xpose.msrb.mxu1 %v938_v14  ;;  %v1178_v49 = vsub.f32 %v1126_v44, %v1142_v48  ;;  %1052 = vmatmul.f32.gmra.mxu3 %v952_v33  ;;  %v1323_v50 = vpop.permute.xlu2 %1322  ;;  %v1360_v33 = vand.u32 4294901760, %v1359_v29 }
 0x137   :  { %1143 = vmatpush.xpose.msrb.mxu2 %v1142_v48  ;;  %v1330_v52 = vsel %vm915_vm1, %v1323_v50, 0 }
 0x138   :  { %1021 = vmatmul.f32.gmra.mxu2 %v951_v26  ;;  %v1179_v54 = vand.u32 4294901760, %v1178_v49  ;;  %v3219_v55 = vand.u32 4294901760, %v1330_v52  ;;  %1214 = vmatpush.xpose.msra.mxu0 %v1178_v49  ;;  %v1361_v37 = vsub.f32 %v1359_v29, %v1360_v33 }
 0x13a   :  { %1104 = vmatpush.xpose.msrb.mxu1 %v940_v30  ;;  %v1180_v56 = vsub.f32 %v1178_v49, %v1179_v54  ;;  %v1382_v57 = vsub.f32 %v1330_v52, %v3219_v55  ;;  %v1117_v58 = vpop.permute.xlu1 %1116  ;;  %v1362_v46 = vand.u32 4294901760, %v1361_v37 }
 0x13b   :  { %v1124_v17 = vsel %vm915_vm1, %v1117_v58, 0 }
 0x13c   :  { %v1181_v31 = vand.u32 4294901760, %v1180_v56  ;;  %v1383_v61 = vand.u32 4294901760, %v1382_v57  ;;  %v1144_v62 = vand.u32 4294901760, %v1124_v17 }
 0x13d   :  { %990 = vmatmul.f32.gmra.mxu1 %v3200_v16  ;;  %1079 = vmatmul.f32.vlgmr.msrb.gmra.mxu0 %v3194_v5 }
 0x13e   :  { %1244 = vmatpush.xpose.msra.mxu1 %v1142_v48  ;;  %v1184_v63 = vsub.f32 %v1124_v17, %v1144_v62  ;;  %v1321_v19 = vpop.permute.xlu2 %1320  ;;  %1145 = vmatpush.xpose.msrb.mxu2 %v1144_v62  ;;  %v1384_v2 = vsub.f32 %v1382_v57, %v1383_v61 }
 0x13f   :  { %1182 = vmatpush.xpose.msrb.mxu3 %v1181_v31  ;;  %v1328_v27 = vsel %vm915_vm1, %v1321_v19, 0 }
 0x140   :  { %v1348_v6 = vand.u32 4294901760, %v1328_v27  ;;  %1217 = vmatpush.xpose.msra.mxu0 %v1184_v63  ;;  %v1185_v7 = vand.u32 4294901760, %v1184_v63  ;;  %v1385_v12 = vand.u32 4294901760, %v1384_v2  ;;  %v3293_v2 = vld [vmem:[%s3500_s2] sm:$0xff] }
 0x141   :  { %1151 = vmatmul.f32.vlgmr.msrb.gmra.mxu2 %v1150_v1 }
 0x142   :  { %1246 = vmatpush.xpose.msra.mxu1 %v1144_v62  ;;  %1277 = vmatpush.xpose.msra.mxu2 %v1179_v54  ;;  %v1388_v8 = vsub.f32 %v1328_v27, %v1348_v6  ;;  %v1186_v10 = vsub.f32 %v1184_v63, %v1185_v7 }
 0x144   :  { %1347 = vmatpush.xpose.msrb.mxu0 %v3219_v55  ;;  %v1389_v13 = vand.u32 4294901760, %v1388_v8  ;;  %v1187_v14 = vand.u32 4294901760, %v1186_v10 }
 0x145   :  { %1083 = vmatmul.f32.gmra.mxu0 %v3200_v16  ;;  %1106 = vmatmul.f32.vlgmr.msrb.gmra.mxu1 %v3194_v5  ;;  %v1351_v5 = vsub.f32 %v1324_v21, %v3240_v22 }
 0x146   :  { %1281 = vmatpush.xpose.msra.mxu2 %v1185_v7  ;;  %1386 = vmatpush.xpose.msrb.mxu1 %v1385_v12  ;;  %v1390_v15 = vsub.f32 %v1388_v8, %v1389_v13  ;;  %v3299_v12 = vld [vmem:[%s3500_s2 + $0x8] sm:$0xff] }
 0x147   :  { %1188 = vmatpush.xpose.msrb.mxu3 %v1187_v14  ;;  %v1352_v26 = vand.u32 4294901760, %v1351_v5 }
 0x148   :  { %1349 = vmatpush.xpose.msrb.mxu0 %v1348_v6  ;;  %v1391_v20 = vand.u32 4294901760, %v1390_v15 }
 0x149   :  { %1159 = vmatmul.f32.gmra.mxu2 %v1158_v18 }
 0x14a   :  { %1418 = vmatpush.xpose.msrb.mxu2 %v1382_v57  ;;  %1190 = vmatmul.f32.vlgmr.msrb.gmra.mxu3 %v3206_v38 }
 0x14b   :  { %1306 = vmatpush.xpose.msra.mxu3 %v1142_v48  ;;  %1392 = vmatpush.xpose.msrb.mxu1 %v1391_v20 }
 0x14d   :  { %1110 = vmatmul.f32.gmra.mxu1 %v3200_v16  ;;  %1220 = vmatmul.f32.vlgmr.msra.gmra.mxu0 %v3209_v43  ;;  %v1353_v16 = vsub.f32 %v1351_v5, %v1352_v26  ;;  %v1530_v43 = vsel %vm915_vm1, %v3186_v4, 0 }
 0x14e   :  { %1421 = vmatpush.xpose.msrb.mxu2 %v1388_v8  ;;  %1481 = vmatpush.xpose.msra.mxu0 %v1383_v61  ;;  %v1562_v49 = vand.u32 4294901760, %v1530_v43 }
 0x14f   :  { %1308 = vmatpush.xpose.msra.mxu3 %v1144_v62  ;;  %v1354_v3 = vand.u32 4294901760, %v1353_v16 }
 0x150   :  { %v1563_v57 = vsub.f32 %v1530_v43, %v1562_v49 }
 0x151   :  { %1283 = vmatmul.f32.vlgmr.msra.gmra.mxu2 %v3206_v38 }
 0x152   :  { %1194 = vmatmul.f32.gmra.mxu3 %v3215_v51  ;;  %1485 = vmatpush.xpose.msra.mxu0 %v1389_v13  ;;  %v1564_v61 = vand.u32 4294901760, %v1563_v57 }
 0x153   :  { %1448 = vmatpush.xpose.msrb.mxu3 %v3219_v55 }
 0x154   :  { %v1565_v27 = vsub.f32 %v1563_v57, %v1564_v61 }
 0x155   :  { %1250 = vmatmul.f32.vlgmr.msra.gmra.mxu1 %v1148_v45  ;;  %1225 = vmatmul.f32.gmra.mxu0 %v3227_v23 }
 0x156   :  { %1510 = vmatpush.xpose.msra.mxu1 %v3219_v55  ;;  %v1566_v1 = vand.u32 4294901760, %v1565_v27 }
 0x157   :  { %1450 = vmatpush.xpose.msrb.mxu3 %v1348_v6 }
 0x159   :  { %1287 = vmatmul.f32.gmra.mxu2 %v3215_v51 }
 0x15a   :  { %1310 = vmatmul.f32.vlgmr.msra.gmra.mxu3 %v3206_v38  ;;  %1512 = vmatpush.xpose.msra.mxu1 %v1348_v6  ;;  %v1525_v30 = vpop.permute.xlu1 %1524  ;;  %v1555_v38 = vsub.f32 %v1528_v32, %v3262_v36 }
 0x15b   :  { %v1532_v34 = vsel %vm915_vm1, %v1525_v30, 0 }
 0x15c   :  { %v1552_v39 = vand.u32 4294901760, %v1532_v34  ;;  %v1556_v50 = vand.u32 4294901760, %v1555_v38 }
 0x15d   :  { %1256 = vmatmul.f32.gmra.mxu1 %v1156_v42  ;;  %1355 = vmatmul.f32.vlgmr.msrb.gmra.mxu0 %v1354_v3 }
 0x15e   :  { %v1592_v47 = vsub.f32 %v1532_v34, %v1552_v39  ;;  %v1557_v56 = vsub.f32 %v1555_v38, %v1556_v50 }
 0x160   :  { %v1593_v52 = vand.u32 4294901760, %v1592_v47  ;;  %v1558_v31 = vand.u32 4294901760, %v1557_v56 }
 0x161   :  { %1424 = vmatmul.f32.vlgmr.msrb.gmra.mxu2 %v1351_v5 }
 0x162   :  { %1314 = vmatmul.f32.gmra.mxu3 %v3215_v51  ;;  %v1527_v40 = vpop.permute.xlu0 %1526  ;;  %v1594_v59 = vsub.f32 %v1592_v47, %v1593_v52 }
 0x163   :  { %v1534_v41 = vsel %vm915_vm1, %v1527_v40, 0 }
 0x164   :  { %v1550_v44 = vand.u32 4294901760, %v1534_v41  ;;  %v1595_v63 = vand.u32 4294901760, %v1594_v59 }
 0x165   :  { %1394 = vmatmul.f32.vlgmr.msrb.gmra.mxu1 %v3240_v22  ;;  %1363 = vmatmul.f32.gmra.mxu0 %v1362_v46 }
 0x166   :  { %v1586_v48 = vsub.f32 %v1534_v41, %v1550_v44  ;;  %1551 = vmatpush.xpose.msra.mxu2 %v1550_v44  ;;  %1652 = vmatpush.xpose.msrb.mxu1 %v1550_v44 }
 0x168   :  { %v1587_v51 = vand.u32 4294901760, %v1586_v48  ;;  %1622 = vmatpush.xpose.msrb.mxu0 %v1586_v48 }
 0x169   :  { %1429 = vmatmul.f32.gmra.mxu2 %v1359_v29 }
 0x16a   :  { %v1588_v45 = vsub.f32 %v1586_v48, %v1587_v51  ;;  %1454 = vmatmul.f32.vlgmr.msrb.gmra.mxu3 %v1352_v26  ;;  %v1922_v54 = vpop.permute.xlu0 %1921  ;;  %1553 = vmatpush.xpose.msra.mxu2 %v1552_v39 }
 0x16b   :  { %v3270_v55 = vand.u32 4294901760, %v1922_v54  ;;  %1654 = vmatpush.xpose.msrb.mxu1 %v1552_v39 }
 0x16c   :  { %v1589_v58 = vand.u32 4294901760, %v1588_v45  ;;  %1625 = vmatpush.xpose.msrb.mxu0 %v1592_v47 }
 0x16d   :  { %v3273_v17 = vsub.f32 %v1922_v54, %v3270_v55  ;;  %1398 = vmatmul.f32.gmra.mxu1 %v3250_v25  ;;  %1487 = vmatmul.f32.vlgmr.msra.gmra.mxu0 %v3240_v22 }
 0x16e   :  { %1685 = vmatpush.xpose.msrb.mxu2 %v1587_v51  ;;  %1590 = vmatpush.xpose.msra.mxu3 %v1589_v58 }
 0x16f   :  { %v1982_v23 = vand.u32 4294901760, %v3273_v17 }
 0x170   :  { %1946 = vmatpush.msra.mxu0 %v3270_v55 }
 0x171   :  { %v1983_v62 = vsub.f32 %v3273_v17, %v1982_v23  ;;  %1559 = vmatmul.f32.vlgmr.msra.gmra.mxu2 %v1558_v31 }
 0x172   :  { %1689 = vmatpush.xpose.msrb.mxu2 %v1593_v52  ;;  %1460 = vmatmul.f32.gmra.mxu3 %v1360_v33 }
 0x173   :  { %v1984_v19 = vand.u32 4294901760, %v1983_v62  ;;  %1596 = vmatpush.xpose.msra.mxu3 %v1595_v63 }
 0x175   :  { %1514 = vmatmul.f32.vlgmr.msra.gmra.mxu1 %v3240_v22  ;;  %1491 = vmatmul.f32.gmra.mxu0 %v3250_v25 }
 0x176   :  { %2017 = vmatpush.msra.mxu2 %v3273_v17  ;;  %1985 = vmatpush.msra.mxu1 %v1984_v19 }
 0x177   :  { %1714 = vmatpush.xpose.msrb.mxu3 %v1550_v44 }
 0x179   :  { %1567 = vmatmul.f32.gmra.mxu2 %v1566_v1 }
 0x17a   :  { %1598 = vmatmul.f32.vlgmr.msra.gmra.mxu3 %v3262_v36 }
 0x17b   :  { %1716 = vmatpush.xpose.msrb.mxu3 %v1552_v39 }
 0x17d   :  { %1518 = vmatmul.f32.gmra.mxu1 %v3250_v25  ;;  %1628 = vmatmul.f32.vlgmr.msrb.gmra.mxu0 %v1555_v38 }
 0x17f   :  { %2047 = vmatpush.msra.mxu3 %v3270_v55 }
 0x181   :  { %1691 = vmatmul.f32.vlgmr.msrb.gmra.mxu2 %v3262_v36 }
 0x182   :  { %1602 = vmatmul.f32.gmra.mxu3 %v1562_v49 }
 0x185   :  { %1658 = vmatmul.f32.vlgmr.msrb.gmra.mxu1 %v1556_v50  ;;  %1633 = vmatmul.f32.gmra.mxu0 %v1563_v57 }
 0x189   :  { %1695 = vmatmul.f32.gmra.mxu2 %v1562_v49 }
 0x18a   :  { %1718 = vmatmul.f32.vlgmr.msrb.gmra.mxu3 %v3262_v36 }
 0x18d   :  { %1664 = vmatmul.f32.gmra.mxu1 %v1564_v61 }
 0x192   :  { %1722 = vmatmul.f32.gmra.mxu3 %v1562_v49 }
 0x1aa   :  { %v948_v42 = vpop.f32.mrf.mxu0 }
 0x1ab   :  { %v949_v10 = vadd.f32 %v948_v42, %v3293_v2 }
 0x1b1   :  { %v1047_v15 = vpop.f32.mrf.mxu3 }
 0x1b2   :  { %v956_v6 = vpop.f32.mrf.mxu0  ;;  %v987_v7 = vpop.f32.mrf.mxu1 }
 0x1b3   :  { %v1017_v8 = vpop.f32.mrf.mxu2  ;;  %v988_v9 = vadd.f32 %v987_v7, %v949_v10  ;;  %v957_v21 = vadd.f32 %v956_v6, %v3299_v12 }
 0x1b5   :  { %v1018_v18 = vadd.f32 %v1017_v8, %v988_v9 }
 0x1b7   :  { %v1048_v5 = vadd.f32 %v1047_v15, %v1018_v18 }
 0x1b9   :  { %v1053_v32 = vpop.f32.mrf.mxu3 }
 0x1ba   :  { %v991_v13 = vpop.f32.mrf.mxu1  ;;  %v1080_v14 = vpop.f32.mrf.mxu0 }
 0x1bb   :  { %v1022_v20 = vpop.f32.mrf.mxu2  ;;  %v992_v22 = vadd.f32 %v991_v13, %v957_v21  ;;  %v1081_v24 = vadd.f32 %v1080_v14, %v1048_v5 }
 0x1bd   :  { %v1023_v16 = vadd.f32 %v1022_v20, %v992_v22 }
 0x1bf   :  { %v1054_v33 = vadd.f32 %v1053_v32, %v1023_v16 }
 0x1c2   :  { %v1084_v25 = vpop.f32.mrf.mxu0  ;;  %v1107_v26 = vpop.f32.mrf.mxu1 }
 0x1c3   :  { %v3302_v29 = vadd.f32 %v1107_v26, %v1081_v24  ;;  %v1085_v34 = vadd.f32 %v1084_v25, %v1054_v33 }
 0x1c4   :  { %v1152_v30 = vpop.f32.mrf.mxu2 }
 0x1c5   :  { %v1727_v3 = vsel %vm1726_vm2, %v3302_v29, -inf  ;;  %v1153_v43 = vadd.f32 %v1152_v30, %v3293_v2 }
 0x1c6   :  { %1728 = vmax.xlane.f32.xlu2 %v1727_v3 }
 0x1ca   :  { %v1111_v36 = vpop.f32.mrf.mxu1  ;;  %v1221_v39 = vpop.f32.mrf.mxu0 }
 0x1cb   :  { %v3306_v37 = vadd.f32 %v1111_v36, %v1085_v34 }
 0x1cc   :  { %v1160_v40 = vpop.f32.mrf.mxu2 }
 0x1cd   :  { %v1191_v38 = vpop.f32.mrf.mxu3  ;;  %v1730_v41 = vsel %vm1726_vm2, %v3306_v37, -inf  ;;  %v1161_v51 = vadd.f32 %v1160_v40, %v3299_v12 }
 0x1ce   :  { %1731 = vmax.xlane.f32.xlu0 %v1730_v41  ;;  %v1192_v44 = vadd.f32 %v1191_v38, %v1153_v43 }
 0x1d0   :  { %v1222_v50 = vadd.f32 %v1221_v39, %v1192_v44 }
 0x1d2   :  { %v1251_v46 = vpop.f32.mrf.mxu1  ;;  %v1226_v47 = vpop.f32.mrf.mxu0 }
 0x1d3   :  { %v1252_v52 = vadd.f32 %v1251_v46, %v1222_v50 }
 0x1d4   :  { %v1284_v48 = vpop.f32.mrf.mxu2 }
 0x1d5   :  { %v1195_v49 = vpop.f32.mrf.mxu3  ;;  %v1285_v57 = vadd.f32 %v1284_v48, %v1252_v52 }
 0x1d6   :  { %v1196_v45 = vadd.f32 %v1195_v49, %v1161_v51 }
 0x1d8   :  { %v1227_v31 = vadd.f32 %v1226_v47, %v1196_v45 }
 0x1da   :  { %v1257_v54 = vpop.f32.mrf.mxu1  ;;  %v1356_v56 = vpop.f32.mrf.mxu0 }
 0x1db   :  { %v1258_v62 = vadd.f32 %v1257_v54, %v1227_v31  ;;  %v1357_v7 = vadd.f32 %v1356_v56, %v3293_v2 }
 0x1dc   :  { %v1288_v58 = vpop.f32.mrf.mxu2 }
 0x1dd   :  { %v1311_v59 = vpop.f32.mrf.mxu3  ;;  %v1289_v27 = vadd.f32 %v1288_v58, %v1258_v62 }
 0x1de   :  { %v3312_v61 = vadd.f32 %v1311_v59, %v1285_v57 }
 0x1e0   :  { %v1733_v63 = vsel %vm1726_vm2, %v3312_v61, -inf }
 0x1e1   :  { %1734 = vmax.xlane.f32.xlu1 %v1733_v63 }
 0x1e2   :  { %v1395_v19 = vpop.f32.mrf.mxu1  ;;  %v1364_v1 = vpop.f32.mrf.mxu0 }
 0x1e3   :  { %v1396_v10 = vadd.f32 %v1395_v19, %v1357_v7  ;;  %v1365_v20 = vadd.f32 %v1364_v1, %v3299_v12 }
 0x1e4   :  { %v1425_v42 = vpop.f32.mrf.mxu2 }
 0x1e5   :  { %v1315_v6 = vpop.f32.mrf.mxu3  ;;  %v1426_v14 = vadd.f32 %v1425_v42, %v1396_v10 }
 0x1e6   :  { %v3317_v8 = vadd.f32 %v1315_v6, %v1289_v27 }
 0x1e8   :  { %v1736_v9 = vsel %vm1726_vm2, %v3317_v8, -inf }
 0x1e9   :  { %1737 = vmax.xlane.f32.xlu2 %v1736_v9 }
 0x1ea   :  { %v1399_v13 = vpop.f32.mrf.mxu1  ;;  %v1488_v21 = vpop.f32.mrf.mxu0 }
 0x1eb   :  { %v1400_v5 = vadd.f32 %v1399_v13, %v1365_v20 }
 0x1ec   :  { %v1430_v15 = vpop.f32.mrf.mxu2 }
 0x1ed   :  { %v1455_v18 = vpop.f32.mrf.mxu3  ;;  %v1431_v16 = vadd.f32 %v1430_v15, %v1400_v5 }
 0x1ee   :  { %v1456_v22 = vadd.f32 %v1455_v18, %v1426_v14 }
 0x1f0   :  { %v1489_v24 = vadd.f32 %v1488_v21, %v1456_v22 }
 0x1f2   :  { %v1515_v25 = vpop.f32.mrf.mxu1  ;;  %v1492_v34 = vpop.f32.mrf.mxu0 }
 0x1f3   :  { %v3322_v26 = vadd.f32 %v1515_v25, %v1489_v24 }
 0x1f4   :  { %v1560_v30 = vpop.f32.mrf.mxu2 }
 0x1f5   :  { %v1461_v32 = vpop.f32.mrf.mxu3  ;;  %v1739_v3 = vsel %vm1726_vm2, %v3322_v26, -inf  ;;  %v1561_v44 = vadd.f32 %v1560_v30, %v3293_v2 }
 0x1f6   :  { %v1462_v33 = vadd.f32 %v1461_v32, %v1431_v16  ;;  %1740 = vmax.xlane.f32.xlu2 %v1739_v3 }
 0x1f8   :  { %v1493_v36 = vadd.f32 %v1492_v34, %v1462_v33 }
 0x1fa   :  { %v1519_v39 = vpop.f32.mrf.mxu1  ;;  %v1629_v46 = vpop.f32.mrf.mxu0 }
 0x1fb   :  { %v3326_v40 = vadd.f32 %v1519_v39, %v1493_v36 }
 0x1fc   :  { %v1568_v38 = vpop.f32.mrf.mxu2 }
 0x1fd   :  { %v1599_v41 = vpop.f32.mrf.mxu3  ;;  %v1742_v43 = vsel %vm1726_vm2, %v3326_v40, -inf  ;;  %v1569_v52 = vadd.f32 %v1568_v38, %v3299_v12 }
 0x1fe   :  { %1743 = vmax.xlane.f32.xlu1 %v1742_v43  ;;  %v1600_v47 = vadd.f32 %v1599_v41, %v1561_v44 }
 0x200   :  { %v1630_v50 = vadd.f32 %v1629_v46, %v1600_v47 }
 0x202   :  { %v1659_v48 = vpop.f32.mrf.mxu1  ;;  %v1634_v56 = vpop.f32.mrf.mxu0 }
 0x203   :  { %v1660_v45 = vadd.f32 %v1659_v48, %v1630_v50 }
 0x204   :  { %v1692_v51 = vpop.f32.mrf.mxu2 }
 0x205   :  { %v1603_v49 = vpop.f32.mrf.mxu3  ;;  %v1693_v57 = vadd.f32 %v1692_v51, %v1660_v45 }
 0x206   :  { %v1604_v54 = vadd.f32 %v1603_v49, %v1569_v52 }
 0x208   :  { %v1635_v31 = vadd.f32 %v1634_v56, %v1604_v54 }
 0x20a   :  { %v1665_v58 = vpop.f32.mrf.mxu1 }
 0x20b   :  { %v1666_v63 = vadd.f32 %v1665_v58, %v1635_v31 }
 0x20c   :  { %v1696_v2 = vpop.f32.mrf.mxu2 }
 0x20d   :  { %v1719_v59 = vpop.f32.mrf.mxu3  ;;  %v1697_v27 = vadd.f32 %v1696_v2, %v1666_v63 }
 0x20e   :  { %v1720_v62 = vadd.f32 %v1719_v59, %v1693_v57 }
 0x210   :  { %v1745_v19 = vsel %vm1726_vm2, %v1720_v62, -inf }
 0x211   :  { %1746 = vmax.xlane.f32.xlu0 %v1745_v19 }
 0x215   :  { %v1723_v1 = vpop.f32.mrf.mxu3 }
 0x216   :  { %v1724_v42 = vadd.f32 %v1723_v1, %v1697_v27 }
 0x217   :  { %2123 = vrot.lane.b32.xlu1 %v3166_v28, %s2832_s24 }
 0x218   :  { %v1748_v12 = vsel %vm1726_vm2, %v1724_v42, -inf }
 0x219   :  { %1749 = vmax.xlane.f32.xlu2 %v1748_v12 }
 0x239   :  { %v1729_v6 = vpop.xlane.xlu2 %1728 }
 0x23a   :  { %v1751_v7 = vsub.f32 %v3302_v29, %v1729_v6 }
 0x23c   :  { %v1759_v10 = vmul.f32 1.442695, %v1751_v7 }
 0x23e   :  { %2773 = vpow2.f32 %v1759_v10 }
 0x241   :  { %v1732_v9 = vpop.xlane.xlu0 %1731 }
 0x242   :  { %v1752_v13 = vsub.f32 %v3306_v37, %v1732_v9 }
 0x244   :  { %v3338_v14 = vpop.eup %2773  ;;  %v1761_v15 = vmul.f32 1.442695, %v1752_v13 }
 0x245   :  { %v1775_v18 = vsel %vm1726_vm2, %v3338_v14, 0.0 }
 0x246   :  { %2775 = vpow2.f32 %v1761_v15  ;;  %1776 = vadd.xlane.f32.xlu0 %v1775_v18 }
 0x24c   :  { %v3342_v28 = vpop.eup %2775 }
 0x24d   :  { %v1778_v20 = vsel %vm1726_vm2, %v3342_v28, 0.0 }
 0x24e   :  { %1779 = vadd.xlane.f32.xlu2 %v1778_v20 }
 0x254   :  { %v1735_v29 = vpop.xlane.xlu1 %1734 }
 0x255   :  { %v1753_v21 = vsub.f32 %v3312_v61, %v1735_v29 }
 0x257   :  { %v1763_v22 = vmul.f32 1.442695, %v1753_v21 }
 0x259   :  { %2777 = vpow2.f32 %v1763_v22 }
 0x25a   :  { %2121 = vrot.lane.b32.xlu0 %v3170_v35, %s2832_s24 }
 0x25c   :  { %v1738_v37 = vpop.xlane.xlu2 %1737 }
 0x25d   :  { %v1754_v5 = vsub.f32 %v3317_v8, %v1738_v37 }
 0x25f   :  { %v3350_v24 = vpop.eup %2777  ;;  %v1765_v25 = vmul.f32 1.442695, %v1754_v5 }
 0x260   :  { %v1781_v16 = vsel %vm1726_vm2, %v3350_v24, 0.0 }
 0x261   :  { %2779 = vpow2.f32 %v1765_v25  ;;  %1782 = vadd.xlane.f32.xlu1 %v1781_v16 }
 0x262   :  { %2325 = vrot.lane.b32.xlu0 %v3174_v53, %s2832_s24 }
 0x266   :  { %1919 = vrot.lane.b32.xlu2 %v3162_v11, %s2832_s24 }
 0x267   :  { %v3358_v61 = vpop.eup %2779 }
 0x268   :  { %v1784_v35 = vsel %vm1726_vm2, %v3358_v61, 0.0 }
 0x269   :  { %1785 = vadd.xlane.f32.xlu1 %v1784_v35  ;;  %v1741_v8 = vpop.xlane.xlu2 %1740 }
 0x26a   :  { %v1755_v30 = vsub.f32 %v3322_v26, %v1741_v8 }
 0x26c   :  { %v1767_v33 = vmul.f32 1.442695, %v1755_v30 }
 0x26e   :  { %2781 = vpow2.f32 %v1767_v33 }
 0x271   :  { %v1744_v32 = vpop.xlane.xlu1 %1743 }
 0x272   :  { %v1756_v3 = vsub.f32 %v3326_v40, %v1744_v32 }
 0x274   :  { %v1769_v34 = vmul.f32 1.442695, %v1756_v3  ;;  %v3364_v11 = vpop.eup %2781 }
 0x275   :  { %v1787_v41 = vsel %vm1726_vm2, %v3364_v11, 0.0 }
 0x276   :  { %2783 = vpow2.f32 %v1769_v34 }
 0x27c   :  { %v3366_v38 = vpop.eup %2783 }
 0x27d   :  { %v1790_v40 = vsel %vm1726_vm2, %v3366_v38, 0.0 }
 0x284   :  { %v1747_v36 = vpop.xlane.xlu0 %1746 }
 0x285   :  { %v1757_v53 = vsub.f32 %v1720_v62, %v1747_v36 }
 0x287   :  { %v1771_v39 = vmul.f32 1.442695, %v1757_v53 }
 0x289   :  { %2785 = vpow2.f32 %v1771_v39  ;;  %v2124_v50 = vpop.permute.xlu1 %2123 }
 0x28a   :  { %v3386_v52 = vand.u32 4294901760, %v2124_v50 }
 0x28c   :  { %v1750_v43 = vpop.xlane.xlu2 %1749  ;;  %1788 = vadd.xlane.f32.xlu0 %v1787_v41  ;;  %v3389_v45 = vsub.f32 %v2124_v50, %v3386_v52 }
 0x28d   :  { %v1758_v26 = vsub.f32 %v1724_v42, %v1750_v43 }
 0x28f   :  { %v3372_v44 = vpop.eup %2785  ;;  %v1773_v46 = vmul.f32 1.442695, %v1758_v26  ;;  %1791 = vadd.xlane.f32.xlu2 %v1790_v40 }
 0x290   :  { %v1793_v47 = vsel %vm1726_vm2, %v3372_v44, 0.0 }
 0x291   :  { %2787 = vpow2.f32 %v1773_v46  ;;  %1794 = vadd.xlane.f32.xlu1 %v1793_v47 }
 0x297   :  { %v3376_v48 = vpop.eup %2787 }
 0x298   :  { %v1796_v49 = vsel %vm1726_vm2, %v3376_v48, 0.0 }
 0x299   :  { %1797 = vadd.xlane.f32.xlu2 %v1796_v49 }
 0x2a0   :  { %2525 = vrot.lane.b32.xlu0 %v3182_v0, %s2832_s24  ;;  %v2184_v0 = vand.u32 4294901760, %v3389_v45 }
 0x2aa   :  { %2323 = vrot.lane.b32.xlu1 %v3178_v60, %s2832_s24 }
 0x2b1   :  { %2527 = vrot.lane.b32.xlu2 %v3186_v4, %s2832_s24  ;;  %v2185_v4 = vsub.f32 %v3389_v45, %v2184_v0 }
 0x2b3   :  { %v2186_v6 = vand.u32 4294901760, %v2185_v4 }
 0x2b9   :  { %v1777_v51 = vpop.xlane.xlu0 %1776 }
 0x2ba   :  { %2789 = vrcp.f32 %v1777_v51  ;;  %v1810_v59 = vand.u32 2147483648, %v1777_v51  ;;  %v1808_v31 = vand.u32 2147483647, %v1777_v51  ;;  %vm1804_vm4 = vweird.f32 %v1777_v51 }
 0x2bc   :  { %v1811_v19 = vor.u32 1.1754944e-38, %v1810_v59  ;;  %vm1809_vm6 = vcmp.eq.f32.partialorder %v1808_v31, 8.507059e+37 }
 0x2c0   :  { %v2790_v54 = vpop.eup %2789 }
 0x2c1   :  { %v1800_v56 = vmul.f32 %v2790_v54, %v1777_v51  ;;  %v1780_v57 = vpop.xlane.xlu2 %1779  ;;  %vm1805_vm3 = vweird.f32 %v2790_v54 }
 0x2c2   :  { %2791 = vrcp.f32 %v1780_v57  ;;  %vm1806_vm5 = vmor %vm1804_vm4, %vm1805_vm3  ;;  %v1823_v9 = vand.u32 2147483647, %v1780_v57  ;;  %v1825_v13 = vand.u32 2147483648, %v1780_v57  ;;  %vm1819_vm8 = vweird.f32 %v1780_v57 }
 0x2c3   :  { %v1801_v58 = vsub.f32 1.0, %v1800_v56 }
 0x2c4   :  { %v1826_v25 = vor.u32 1.1754944e-38, %v1825_v13  ;;  %vm1824_vm10 = vcmp.eq.f32.partialorder %v1823_v9, 8.507059e+37 }
 0x2c5   :  { %v1802_v60 = vmul.f32 %v2790_v54, %v1801_v58 }
 0x2c7   :  { %v1803_v62 = vadd.f32 %v2790_v54, %v1802_v60 }
 0x2c8   :  { %v2792_v63 = vpop.eup %2791 }
 0x2c9   :  { %v1807_v2 = vsel %vm1806_vm5, %v2790_v54, %v1803_v62  ;;  %v1815_v27 = vmul.f32 %v2792_v63, %v1780_v57  ;;  %v1920_v1 = vpop.permute.xlu2 %1919  ;;  %vm1820_vm7 = vweird.f32 %v2792_v63 }
 0x2ca   :  { %v1812_v42 = vsel %vm1809_vm6, %v1811_v19, %v1807_v2  ;;  %v1947_v12 = vand.u32 4294901760, %v1920_v1  ;;  %vm1821_vm9 = vmor %vm1819_vm8, %vm1820_vm7 }
 0x2cb   :  { %v1813_v7 = vmul.f32 %v3338_v14, %v1812_v42  ;;  %v1816_v10 = vsub.f32 1.0, %v1815_v27 }
 0x2cc   :  { %v1987_v15 = vsub.f32 %v1920_v1, %v1947_v12  ;;  %1948 = vmatpush.msra.mxu0 %v1947_v12  ;;  %2049 = vmatpush.msra.mxu3 %v1947_v12  ;;  %v2122_v18 = vpop.permute.xlu0 %2121 }
 0x2cd   :  { %v1817_v20 = vmul.f32 %v2792_v63, %v1816_v10  ;;  %v2149_v29 = vand.u32 4294901760, %v2122_v18  ;;  %v1926_v21 = vsel %vm1726_vm2, %v1813_v7, 0 }
 0x2ce   :  { %2080 = vmatpush.msrb.mxu0 %v1982_v23  ;;  %2187 = vmatpush.msrb.mxu3 %v2186_v6  ;;  %v1988_v22 = vand.u32 4294901760, %v1987_v15  ;;  %v3397_v37 = vand.u32 4294901760, %v1926_v21 }
 0x2cf   :  { %2020 = vmatpush.msra.mxu2 %v1987_v15  ;;  %v1818_v14 = vadd.f32 %v2792_v63, %v1817_v20  ;;  %v2189_v5 = vsub.f32 %v2122_v18, %v2149_v29 }
 0x2d0   :  { %2084 = vmatpush.msrb.mxu0 %v1988_v22  ;;  %v1950_v16 = vsub.f32 %v1926_v21, %v3397_v37  ;;  %v1989_v35 = vsub.f32 %v1987_v15, %v1988_v22 }
 0x2d1   :  { %2148 = vmatpush.msrb.mxu2 %v3386_v52  ;;  %v2190_v17 = vand.u32 4294901760, %v2189_v5  ;;  %v1822_v23 = vsel %vm1821_vm9, %v2792_v63, %v1818_v14 }
 0x2d2   :  { %2023 = vmatmul.f32.vlgmr.msra.gmra.mxu2 %v1950_v16  ;;  %v1990_v8 = vand.u32 4294901760, %v1989_v35  ;;  %v1951_v30 = vand.u32 4294901760, %v1950_v16  ;;  %v1827_v32 = vsel %vm1824_vm10, %v1826_v25, %v1822_v23 }
 0x2d3   :  { %2150 = vmatpush.msrb.mxu2 %v2149_v29  ;;  %v2191_v3 = vsub.f32 %v2189_v5, %v2190_v17  ;;  %v1828_v33 = vmul.f32 %v3342_v28, %v1827_v32 }
 0x2d4   :  { %v1783_v34 = vpop.xlane.xlu1 %1782  ;;  %1991 = vmatpush.msra.mxu1 %v1990_v8  ;;  %2053 = vmatmul.f32.vlgmr.msra.gmra.mxu3 %v1951_v30  ;;  %v2326_v36 = vpop.permute.xlu0 %2325  ;;  %v1952_v53 = vsub.f32 %v1950_v16, %v1951_v30 }
 0x2d5   :  { %2282 = vmatpush.msra.mxu2 %v2184_v0  ;;  %2793 = vrcp.f32 %v1783_v34  ;;  %1993 = vmatmul.f32.vlgmr.msra.gmra.mxu1 %v3397_v37  ;;  %v3403_v39 = vand.u32 4294901760, %v2326_v36  ;;  %v2192_v41 = vand.u32 4294901760, %v2191_v3  ;;  %v1929_v26 = vsel %vm1726_vm2, %v1828_v33, 0 }
 0x2d6   :  { %2109 = vmatpush.msrb.mxu1 %v3270_v55  ;;  %v1953_v43 = vand.u32 4294901760, %v1952_v53  ;;  %v3407_v40 = vand.u32 4294901760, %v1929_v26  ;;  %v1838_v57 = vand.u32 2147483647, %v1783_v34  ;;  %vm1834_vm12 = vweird.f32 %v1783_v34 }
 0x2d7   :  { %2286 = vmatpush.msra.mxu2 %v2190_v17  ;;  %v3410_v28 = vsub.f32 %v2326_v36, %v3403_v39  ;;  %2193 = vmatpush.msrb.mxu3 %v2192_v41 }
 0x2d8   :  { %2111 = vmatpush.msrb.mxu1 %v1947_v12  ;;  %1954 = vmatmul.f32.vlgmr.msra.gmra.mxu0 %v1953_v43  ;;  %v1958_v46 = vsub.f32 %v1929_v26, %v3407_v40  ;;  %vm1839_vm14 = vcmp.eq.f32.partialorder %v1838_v57, 8.507059e+37 }
 0x2d9   :  { %2219 = vmatpush.msra.mxu0 %v3389_v45  ;;  %2311 = vmatpush.msra.mxu3 %v3386_v52  ;;  %v2386_v50 = vand.u32 4294901760, %v3410_v28  ;;  %v1840_v45 = vand.u32 2147483648, %v1783_v34 }
 0x2da   :  { %2249 = vmatpush.msra.mxu1 %v3386_v52  ;;  %2028 = vmatmul.f32.gmra.mxu2 %v1958_v46  ;;  %v1959_v47 = vand.u32 4294901760, %v1958_v46 }
 0x2db   :  { %v2794_v55 = vpop.eup %2793  ;;  %2222 = vmatpush.msra.mxu0 %v2189_v5  ;;  %2313 = vmatpush.msra.mxu3 %v2149_v29  ;;  %v2387_v52 = vsub.f32 %v3410_v28, %v2386_v50  ;;  %v1841_v31 = vor.u32 1.1754944e-38, %v1840_v45 }
 0x2dc   :  { %2251 = vmatpush.msra.mxu1 %v2149_v29  ;;  %v1830_v49 = vmul.f32 %v2794_v55, %v1783_v34  ;;  %v1786_v51 = vpop.xlane.xlu1 %1785  ;;  %2059 = vmatmul.f32.gmra.mxu3 %v1959_v47  ;;  %v1960_v56 = vsub.f32 %v1958_v46, %v1959_v47  ;;  %vm1835_vm11 = vweird.f32 %v2794_v55 }
 0x2dd   :  { %2795 = vrcp.f32 %v1786_v51  ;;  %1997 = vmatmul.f32.gmra.mxu1 %v3407_v40  ;;  %vm1836_vm13 = vmor %vm1834_vm12, %vm1835_vm11  ;;  %v2388_v62 = vand.u32 4294901760, %v2387_v52  ;;  %v1855_v1 = vand.u32 2147483648, %v1786_v51  ;;  %v1853_v12 = vand.u32 2147483647, %v1786_v51 }
 0x2de   :  { %v1831_v54 = vsub.f32 1.0, %v1830_v49  ;;  %v1961_v58 = vand.u32 4294901760, %v1960_v56  ;;  %vm1849_vm1 = vweird.f32 %v1786_v51 }
 0x2df   :  { %v1856_v9 = vor.u32 1.1754944e-38, %v1855_v1  ;;  %vm1854_vm4 = vcmp.eq.f32.partialorder %v1853_v12, 8.507059e+37 }
 0x2e0   :  { %v1832_v0 = vmul.f32 %v2794_v55, %v1831_v54  ;;  %1962 = vmatmul.f32.gmra.mxu0 %v1961_v58 }
 0x2e2   :  { %v1833_v59 = vadd.f32 %v2794_v55, %v1832_v0 }
 0x2e3   :  { %v2796_v60 = vpop.eup %2795 }
 0x2e4   :  { %v1837_v4 = vsel %vm1836_vm13, %v2794_v55, %v1833_v59  ;;  %v1845_v63 = vmul.f32 %v2796_v60, %v1786_v51  ;;  %vm1850_vm15 = vweird.f32 %v2796_v60 }
 0x2e5   :  { %v1842_v19 = vsel %vm1839_vm14, %v1841_v31, %v1837_v4  ;;  %2113 = vmatmul.f32.vlgmr.msrb.gmra.mxu1 %v3397_v37  ;;  %vm1851_vm3 = vmor %vm1849_vm1, %vm1850_vm15 }
 0x2e6   :  { %v1843_v2 = vmul.f32 %v3350_v24, %v1842_v19  ;;  %v1846_v27 = vsub.f32 1.0, %v1845_v63  ;;  %2389 = vmatpush.msrb.mxu1 %v2388_v62 }
 0x2e8   :  { %v1847_v42 = vmul.f32 %v2796_v60, %v1846_v27  ;;  %v2128_v6 = vsel %vm1726_vm2, %v1843_v2, 0  ;;  %2086 = vmatmul.f32.vlgmr.msrb.gmra.mxu0 %v3397_v37 }
 0x2e9   :  { %v2151_v7 = vand.u32 4294901760, %v2128_v6  ;;  %2350 = vmatpush.msrb.mxu0 %v3403_v39 }
 0x2ea   :  { %v1848_v10 = vadd.f32 %v2796_v60, %v1847_v42 }
 0x2eb   :  { %v2152_v13 = vsub.f32 %v2128_v6, %v2151_v7  ;;  %2195 = vmatmul.f32.vlgmr.msrb.gmra.mxu3 %v2151_v7 }
 0x2ec   :  { %v1852_v24 = vsel %vm1851_vm3, %v2796_v60, %v1848_v10  ;;  %2451 = vmatpush.msrb.mxu3 %v3403_v39 }
 0x2ed   :  { %v1857_v15 = vsel %vm1854_vm4, %v1856_v9, %v1852_v24  ;;  %2117 = vmatmul.f32.gmra.mxu1 %v3407_v40  ;;  %v2153_v18 = vand.u32 4294901760, %v2152_v13 }
 0x2ee   :  { %v1858_v20 = vmul.f32 %v3358_v61, %v1857_v15 }
 0x2ef   :  { %v2154_v29 = vsub.f32 %v2152_v13, %v2153_v18 }
 0x2f0   :  { %v2131_v21 = vsel %vm1726_vm2, %v1858_v20, 0  ;;  %2090 = vmatmul.f32.gmra.mxu0 %v3407_v40 }
 0x2f1   :  { %v2155_v22 = vand.u32 4294901760, %v2154_v29  ;;  %v2159_v37 = vand.u32 4294901760, %v2131_v21 }
 0x2f3   :  { %2156 = vmatmul.f32.vlgmr.msrb.gmra.mxu2 %v2155_v22  ;;  %2199 = vmatmul.f32.gmra.mxu3 %v2159_v37  ;;  %v2160_v14 = vsub.f32 %v2131_v21, %v2159_v37 }
 0x2f4   :  { %2421 = vmatpush.msrb.mxu2 %v3410_v28 }
 0x2f5   :  { %2255 = vmatmul.f32.vlgmr.msra.gmra.mxu1 %v2153_v18  ;;  %v2161_v5 = vand.u32 4294901760, %v2160_v14 }
 0x2f7   :  { %v2162_v25 = vsub.f32 %v2160_v14, %v2161_v5 }
 0x2f8   :  { %2225 = vmatmul.f32.vlgmr.msra.gmra.mxu0 %v2152_v13 }
 0x2f9   :  { %v2163_v16 = vand.u32 4294901760, %v2162_v25 }
 0x2fb   :  { %2164 = vmatmul.f32.gmra.mxu2 %v2163_v16  ;;  %2315 = vmatmul.f32.vlgmr.msra.gmra.mxu3 %v2151_v7 }
 0x2fd   :  { %2261 = vmatmul.f32.gmra.mxu1 %v2161_v5 }
 0x2ff   :  { %v1789_v61 = vpop.xlane.xlu0 %1788 }
 0x300   :  { %2797 = vrcp.f32 %v1789_v61  ;;  %2230 = vmatmul.f32.gmra.mxu0 %v2160_v14  ;;  %v1870_v3 = vand.u32 2147483648, %v1789_v61  ;;  %v1868_v53 = vand.u32 2147483647, %v1789_v61  ;;  %vm1864_vm6 = vweird.f32 %v1789_v61 }
 0x302   :  { %v1792_v35 = vpop.xlane.xlu2 %1791  ;;  %v1871_v47 = vor.u32 1.1754944e-38, %v1870_v3  ;;  %vm1869_vm9 = vcmp.eq.f32.partialorder %v1868_v53, 8.507059e+37 }
 0x303   :  { %2799 = vrcp.f32 %v1792_v35  ;;  %2288 = vmatmul.f32.vlgmr.msra.gmra.mxu2 %v2151_v7  ;;  %2319 = vmatmul.f32.gmra.mxu3 %v2159_v37  ;;  %v1883_v46 = vand.u32 2147483647, %v1792_v35  ;;  %v1885_v55 = vand.u32 2147483648, %v1792_v35  ;;  %vm1879_vm10 = vweird.f32 %v1792_v35 }
 0x304   :  { %v1795_v17 = vpop.xlane.xlu1 %1794 }
 0x305   :  { %2801 = vrcp.f32 %v1795_v17  ;;  %vm1884_vm13 = vcmp.eq.f32.partialorder %v1883_v46, 8.507059e+37  ;;  %v1886_v52 = vor.u32 1.1754944e-38, %v1885_v55  ;;  %v1900_v58 = vand.u32 2147483648, %v1795_v17 }
 0x306   :  { %v2798_v23 = vpop.eup %2797  ;;  %vm1894_vm14 = vweird.f32 %v1795_v17  ;;  %v1898_v31 = vand.u32 2147483647, %v1795_v17 }
 0x307   :  { %v1860_v8 = vmul.f32 %v2798_v23, %v1789_v61  ;;  %vm1865_vm5 = vweird.f32 %v2798_v23  ;;  %v1901_v12 = vor.u32 1.1754944e-38, %v1900_v58 }
 0x308   :  { %vm1866_vm7 = vmor %vm1864_vm6, %vm1865_vm5  ;;  %vm1899_vm1 = vcmp.eq.f32.partialorder %v1898_v31, 8.507059e+37 }
 0x309   :  { %v2800_v30 = vpop.eup %2799  ;;  %v1861_v32 = vsub.f32 1.0, %v1860_v8 }
 0x30a   :  { %v1875_v33 = vmul.f32 %v2800_v30, %v1792_v35  ;;  %vm1880_vm8 = vweird.f32 %v2800_v30 }
 0x30b   :  { %v2802_v34 = vpop.eup %2801  ;;  %v1862_v36 = vmul.f32 %v2798_v23, %v1861_v32  ;;  %2292 = vmatmul.f32.gmra.mxu2 %v2159_v37  ;;  %vm1881_vm12 = vmor %vm1879_vm10, %vm1880_vm8 }
 0x30c   :  { %v1876_v41 = vsub.f32 1.0, %v1875_v33  ;;  %v1890_v43 = vmul.f32 %v2802_v34, %v1795_v17  ;;  %v3432_v26 = vpop.xlane.xlu2 %1797  ;;  %vm1895_vm11 = vweird.f32 %v2802_v34 }
 0x30d   :  { %v1863_v40 = vadd.f32 %v2798_v23, %v1862_v36  ;;  %2803 = vrcp.f32 %v3432_v26  ;;  %vm1896_vm15 = vmor %vm1894_vm14, %vm1895_vm11  ;;  %vm1909_vm4 = vweird.f32 %v3432_v26  ;;  %v1915_v22 = vand.u32 2147483648, %v3432_v26 }
 0x30e   :  { %v1877_v49 = vmul.f32 %v2800_v30, %v1876_v41  ;;  %v1891_v51 = vsub.f32 1.0, %v1890_v43  ;;  %v1913_v25 = vand.u32 2147483647, %v3432_v26 }
 0x30f   :  { %v1867_v54 = vsel %vm1866_vm7, %v2798_v23, %v1863_v40 }
 0x310   :  { %v1872_v56 = vsel %vm1869_vm9, %v1871_v47, %v1867_v54  ;;  %v1878_v57 = vadd.f32 %v2800_v30, %v1877_v49  ;;  %v1892_v45 = vmul.f32 %v2802_v34, %v1891_v51  ;;  %vm1914_vm6 = vcmp.eq.f32.partialorder %v1913_v25, 8.507059e+37 }
 0x311   :  { %v1873_v0 = vmul.f32 %v3364_v11, %v1872_v56 }
 0x312   :  { %v1882_v59 = vsel %vm1881_vm12, %v2800_v30, %v1878_v57  ;;  %v1893_v60 = vadd.f32 %v2802_v34, %v1892_v45  ;;  %v2526_v4 = vpop.permute.xlu0 %2525  ;;  %v1916_v30 = vor.u32 1.1754944e-38, %v1915_v22 }
 0x313   :  { %v2804_v62 = vpop.eup %2803  ;;  %v2330_v63 = vsel %vm1726_vm2, %v1873_v0, 0  ;;  %v1887_v19 = vsel %vm1884_vm13, %v1886_v52, %v1882_v59  ;;  %v3437_v2 = vand.u32 4294901760, %v2526_v4 }
 0x314   :  { %v3439_v27 = vand.u32 4294901760, %v2330_v63  ;;  %v1897_v1 = vsel %vm1896_vm15, %v2802_v34, %v1893_v60  ;;  %v1905_v11 = vmul.f32 %v2804_v62, %v3432_v26  ;;  %v2528_v42 = vpop.permute.xlu2 %2527  ;;  %v1888_v10 = vmul.f32 %v3366_v38, %v1887_v19 }
 0x315   :  { %v3443_v6 = vsub.f32 %v2526_v4, %v3437_v2  ;;  %v3445_v7 = vand.u32 4294901760, %v2528_v42  ;;  %v1902_v24 = vsel %vm1899_vm1, %v1901_v12, %v1897_v1  ;;  %vm1910_vm3 = vweird.f32 %v2804_v62 }
 0x316   :  { %v2354_v9 = vsub.f32 %v2330_v63, %v3439_v27  ;;  %v1906_v13 = vsub.f32 1.0, %v1905_v11  ;;  %v2333_v18 = vsel %vm1726_vm2, %v1888_v10, 0  ;;  %v1903_v14 = vmul.f32 %v3372_v44, %v1902_v24  ;;  %vm1911_vm5 = vmor %vm1909_vm4, %vm1910_vm3 }
 0x317   :  { %v2587_v15 = vsub.f32 %v2528_v42, %v3445_v7  ;;  %v3451_v21 = vand.u32 4294901760, %v2333_v18  ;;  %v2594_v38 = vand.u32 4294901760, %v3443_v6 }
 0x318   :  { %v1907_v20 = vmul.f32 %v2804_v62, %v1906_v13  ;;  %v2355_v29 = vand.u32 4294901760, %v2354_v9  ;;  %v2532_v34 = vsel %vm1726_vm2, %v1903_v14, 0 }
 0x319   :  { %v2588_v37 = vand.u32 4294901760, %v2587_v15  ;;  %v2362_v35 = vsub.f32 %v2333_v18, %v3451_v21  ;;  %v2595_v33 = vsub.f32 %v3443_v6, %v2594_v38  ;;  %v2555_v26 = vand.u32 4294901760, %v2532_v34 }
 0x31a   :  { %v1908_v5 = vadd.f32 %v2804_v62, %v1907_v20  ;;  %v2356_v16 = vsub.f32 %v2354_v9, %v2355_v29 }
 0x31b   :  { %v2589_v61 = vsub.f32 %v2587_v15, %v2588_v37  ;;  %v2363_v53 = vand.u32 4294901760, %v2362_v35  ;;  %v2596_v41 = vand.u32 4294901760, %v2595_v33  ;;  %v2556_v28 = vsub.f32 %v2532_v34, %v2555_v26 }
 0x31c   :  { %v1912_v17 = vsel %vm1911_vm5, %v2804_v62, %v1908_v5  ;;  %v2324_v23 = vpop.permute.xlu1 %2323  ;;  %v2357_v8 = vand.u32 4294901760, %v2356_v16 }
 0x31d   :  { %v2590_v32 = vand.u32 4294901760, %v2589_v61  ;;  %v2351_v3 = vand.u32 4294901760, %v2324_v23  ;;  %v1917_v44 = vsel %vm1914_vm6, %v1916_v30, %v1912_v17  ;;  %v2364_v55 = vsub.f32 %v2362_v35, %v2363_v53 }
 0x31e   :  { %v1918_v40 = vmul.f32 %v3376_v48, %v1917_v44  ;;  %v2557_v49 = vand.u32 4294901760, %v2556_v28 }
 0x31f   :  { %v2391_v36 = vsub.f32 %v2324_v23, %v2351_v3  ;;  %2352 = vmatpush.msrb.mxu0 %v2351_v3  ;;  %2453 = vmatpush.msrb.mxu3 %v2351_v3  ;;  %v2365_v48 = vand.u32 4294901760, %v2364_v55 }
 0x320   :  { %2358 = vmatmul.f32.vlgmr.msrb.gmra.mxu0 %v2357_v8  ;;  %2457 = vmatmul.f32.vlgmr.msrb.gmra.mxu3 %v2355_v29  ;;  %v2558_v54 = vsub.f32 %v2556_v28, %v2557_v49 }
 0x321   :  { %2484 = vmatpush.msra.mxu0 %v2386_v50  ;;  %2591 = vmatpush.msra.mxu3 %v2590_v32  ;;  %v2392_v43 = vand.u32 4294901760, %v2391_v36  ;;  %v2535_v50 = vsel %vm1726_vm2, %v1918_v40, 0 }
 0x322   :  { %2424 = vmatpush.msrb.mxu2 %v2391_v36  ;;  %v2563_v51 = vand.u32 4294901760, %v2535_v50  ;;  %v2559_v57 = vand.u32 4294901760, %v2558_v54 }
 0x323   :  { %2427 = vmatmul.f32.vlgmr.msrb.gmra.mxu2 %v2354_v9  ;;  %2597 = vmatpush.msra.mxu3 %v2596_v41  ;;  %v2393_v46 = vsub.f32 %v2391_v36, %v2392_v43 }
 0x324   :  { %2552 = vmatpush.msra.mxu2 %v3445_v7  ;;  %2488 = vmatpush.msra.mxu0 %v2392_v43  ;;  %v2564_v56 = vsub.f32 %v2535_v50, %v2563_v51 }
 0x325   :  { %2715 = vmatpush.msrb.mxu3 %v3445_v7  ;;  %v2394_v47 = vand.u32 4294901760, %v2393_v46 }
 0x326   :  { %2623 = vmatpush.msrb.mxu0 %v2587_v15  ;;  %2554 = vmatpush.msra.mxu2 %v3437_v2  ;;  %v2565_v45 = vand.u32 4294901760, %v2564_v56 }
 0x327   :  { %2717 = vmatpush.msrb.mxu3 %v3437_v2  ;;  %2395 = vmatpush.msrb.mxu1 %v2394_v47 }
 0x328   :  { %2686 = vmatpush.msrb.mxu2 %v2588_v37  ;;  %2626 = vmatpush.msrb.mxu0 %v3443_v6  ;;  %v2566_v0 = vsub.f32 %v2564_v56, %v2565_v45 }
 0x329   :  { %2366 = vmatmul.f32.gmra.mxu0 %v2365_v48  ;;  %2397 = vmatmul.f32.vlgmr.msrb.gmra.mxu1 %v3439_v27 }
 0x32a   :  { %2690 = vmatpush.msrb.mxu2 %v2594_v38  ;;  %2463 = vmatmul.f32.gmra.mxu3 %v2363_v53 }
 0x32b   :  { %2513 = vmatpush.msra.mxu1 %v3403_v39  ;;  %2432 = vmatmul.f32.gmra.mxu2 %v2362_v35  ;;  %v2567_v39 = vand.u32 4294901760, %v2566_v0 }
 0x32d   :  { %2515 = vmatpush.msra.mxu1 %v2351_v3 }
 0x32f   :  { %2653 = vmatpush.msrb.mxu1 %v3445_v7 }
 0x331   :  { %2655 = vmatpush.msrb.mxu1 %v3437_v2  ;;  %2490 = vmatmul.f32.vlgmr.msra.gmra.mxu0 %v3439_v27 }
 0x332   :  { %2401 = vmatmul.f32.gmra.mxu1 %v3451_v21  ;;  %2599 = vmatmul.f32.vlgmr.msra.gmra.mxu3 %v2555_v26 }
 0x333   :  { %2560 = vmatmul.f32.vlgmr.msra.gmra.mxu2 %v2559_v57 }
 0x339   :  { %2494 = vmatmul.f32.gmra.mxu0 %v3451_v21 }
 0x33a   :  { %2517 = vmatmul.f32.vlgmr.msra.gmra.mxu1 %v3439_v27  ;;  %2603 = vmatmul.f32.gmra.mxu3 %v2563_v51 }
 0x33b   :  { %2568 = vmatmul.f32.gmra.mxu2 %v2567_v39 }
 0x341   :  { %2629 = vmatmul.f32.vlgmr.msrb.gmra.mxu0 %v2556_v28 }
 0x342   :  { %2521 = vmatmul.f32.gmra.mxu1 %v3451_v21  ;;  %2719 = vmatmul.f32.vlgmr.msrb.gmra.mxu3 %v2555_v26 }
 0x343   :  { %2692 = vmatmul.f32.vlgmr.msrb.gmra.mxu2 %v2555_v26 }
 0x349   :  { %2634 = vmatmul.f32.gmra.mxu0 %v2564_v56 }
 0x34a   :  { %2659 = vmatmul.f32.vlgmr.msrb.gmra.mxu1 %v2557_v49  ;;  %2723 = vmatmul.f32.gmra.mxu3 %v2563_v51 }
 0x34b   :  { %2696 = vmatmul.f32.gmra.mxu2 %v2563_v51 }
 0x352   :  { %2665 = vmatmul.f32.gmra.mxu1 %v2565_v45  ;;  %v1994_v52 = vpop.f32.mrf.mxu1 }
 0x355   :  { %v1955_v58 = vpop.f32.mrf.mxu0  ;;  %v2024_v60 = vpop.f32.mrf.mxu2 }
 0x356   :  { %v1995_v59 = vadd.f32 %v1994_v52, %v1955_v58 }
 0x357   :  { %v2054_v4 = vpop.f32.mrf.mxu3 }
 0x358   :  { %v2025_v31 = vadd.f32 %v2024_v60, %v1995_v59 }
 0x35a   :  { %v2055_v62 = vadd.f32 %v2054_v4, %v2025_v31  ;;  %v1998_v63 = vpop.f32.mrf.mxu1 }
 0x35d   :  { %v1963_v19 = vpop.f32.mrf.mxu0  ;;  %v2029_v27 = vpop.f32.mrf.mxu2 }
 0x35e   :  { %v1999_v2 = vadd.f32 %v1998_v63, %v1963_v19 }
 0x35f   :  { %v2060_v11 = vpop.f32.mrf.mxu3 }
 0x360   :  { %v2030_v1 = vadd.f32 %v2029_v27, %v1999_v2 }
 0x362   :  { %v2061_v42 = vadd.f32 %v2060_v11, %v2030_v1  ;;  %v2114_v12 = vpop.f32.mrf.mxu1 }
 0x365   :  { %v2087_v6 = vpop.f32.mrf.mxu0 }
 0x366   :  { %v2088_v7 = vadd.f32 %v2087_v6, %v2055_v62 }
 0x368   :  { %v2115_v10 = vadd.f32 %v2114_v12, %v2088_v7 }
 0x36a   :  { %v2118_v24 = vpop.f32.mrf.mxu1  ;;  %v2727_v27 = vsel %vm36_vm0, %v2115_v10, 0.0 }
 0x36d   :  { %v2091_v9 = vpop.f32.mrf.mxu0 }
 0x36e   :  { %v2092_v13 = vadd.f32 %v2091_v9, %v2061_v42  ;;  %v2196_v18 = vpop.f32.mrf.mxu3 }
 0x370   :  { %v3479_v15 = vadd.f32 %v2118_v24, %v2092_v13 }
 0x372   :  { %v2256_v14 = vpop.f32.mrf.mxu1 }
 0x375   :  { %v2226_v22 = vpop.f32.mrf.mxu0 }
 0x376   :  { %v2157_v20 = vpop.f32.mrf.mxu2  ;;  %v2200_v29 = vpop.f32.mrf.mxu3 }
 0x377   :  { %v2197_v36 = vadd.f32 %v2196_v18, %v2157_v20  ;;  %v2772_v20 = vld [vmem:[%s3501_s3] ss:$0 sm:$0xff]  ;;  %s2833_s3 = smov [#allocation2]  }
 0x378   :  { %s2753_s30 = sshll.u32 %s2833_s3, 4  ;;  %s2754_s30 = int_to_ptr.vmem [resolvable:$true] %s2753_s30 }
 0x379   :  { %v2227_v26 = vadd.f32 %v2226_v22, %v2197_v36 }
 0x37a   :  { %v2262_v35 = vpop.f32.mrf.mxu1 }
 0x37b   :  { %v2257_v55 = vadd.f32 %v2256_v14, %v2227_v26 }
 0x37d   :  { %v2231_v5 = vpop.f32.mrf.mxu0 }
 0x37e   :  { %v2165_v21 = vpop.f32.mrf.mxu2  ;;  %v2316_v38 = vpop.f32.mrf.mxu3 }
 0x37f   :  { %v2201_v46 = vadd.f32 %v2200_v29, %v2165_v21 }
 0x381   :  { %v2232_v54 = vadd.f32 %v2231_v5, %v2201_v46 }
 0x383   :  { %v2263_v52 = vadd.f32 %v2262_v35, %v2232_v54 }
 0x386   :  { %v2289_v37 = vpop.f32.mrf.mxu2  ;;  %v2320_v25 = vpop.f32.mrf.mxu3 }
 0x387   :  { %v2290_v49 = vadd.f32 %v2289_v37, %v2257_v55 }
 0x389   :  { %v2317_v45 = vadd.f32 %v2316_v38, %v2290_v49 }
 0x38b   :  { %v2728_v62 = vsel %vm36_vm0, %v2317_v45, 0.0 }
 0x38c   :  { %v2729_v12 = vadd.f32 %v2728_v62, %v2727_v27 }
 0x38e   :  { %v2293_v61 = vpop.f32.mrf.mxu2 }
 0x38f   :  { %v2294_v63 = vadd.f32 %v2293_v61, %v2263_v52 }
 0x391   :  { %v2321_v7 = vadd.f32 %v2320_v25, %v2294_v63  ;;  %v2734_v25 = vsel %vm36_vm0, %v3479_v15, 0.0 }
 0x393   :  { %v2735_v37 = vsel %vm36_vm0, %v2321_v7, 0.0 }
 0x39d   :  { %v2359_v16 = vpop.f32.mrf.mxu0 }
 0x3a3   :  { %v2458_v17 = vpop.f32.mrf.mxu3 }
 0x3a6   :  { %v2367_v23 = vpop.f32.mrf.mxu0  ;;  %v2428_v8 = vpop.f32.mrf.mxu2 }
 0x3a7   :  { %v2398_v30 = vpop.f32.mrf.mxu1 }
 0x3a8   :  { %v2399_v40 = vadd.f32 %v2398_v30, %v2359_v16 }
 0x3aa   :  { %v2429_v47 = vadd.f32 %v2428_v8, %v2399_v40 }
 0x3ac   :  { %v2459_v57 = vadd.f32 %v2458_v17, %v2429_v47  ;;  %v2736_v17 = vadd.f32 %v2735_v37, %v2734_v25 }
 0x3ad   :  { %v2464_v32 = vpop.f32.mrf.mxu3 }
 0x3ae   :  { %v2433_v3 = vpop.f32.mrf.mxu2  ;;  %v2491_v33 = vpop.f32.mrf.mxu0 }
 0x3af   :  { %v2402_v34 = vpop.f32.mrf.mxu1  ;;  %v2492_v0 = vadd.f32 %v2491_v33, %v2459_v57 }
 0x3b0   :  { %v2403_v56 = vadd.f32 %v2402_v34, %v2367_v23 }
 0x3b2   :  { %v2434_v58 = vadd.f32 %v2433_v3, %v2403_v56 }
 0x3b4   :  { %v2465_v1 = vadd.f32 %v2464_v32, %v2434_v58 }
 0x3b5   :  { %v2600_v44 = vpop.f32.mrf.mxu3 }
 0x3b6   :  { %v2561_v53 = vpop.f32.mrf.mxu2  ;;  %v2495_v41 = vpop.f32.mrf.mxu0 }
 0x3b7   :  { %v2518_v43 = vpop.f32.mrf.mxu1  ;;  %v2601_v39 = vadd.f32 %v2600_v44, %v2561_v53  ;;  %v2496_v9 = vadd.f32 %v2495_v41, %v2465_v1 }
 0x3b8   :  { %v2519_v59 = vadd.f32 %v2518_v43, %v2492_v0 }
 0x3ba   :  { %v2730_v11 = vsel %vm36_vm0, %v2519_v59, 0.0 }
 0x3bb   :  { %v2731_v18 = vadd.f32 %v2730_v11, %v2729_v12 }
 0x3bd   :  { %v2604_v50 = vpop.f32.mrf.mxu3 }
 0x3be   :  { %v2569_v28 = vpop.f32.mrf.mxu2  ;;  %v2630_v51 = vpop.f32.mrf.mxu0 }
 0x3bf   :  { %v2522_v48 = vpop.f32.mrf.mxu1  ;;  %v2631_v60 = vadd.f32 %v2630_v51, %v2601_v39  ;;  %v2605_v13 = vadd.f32 %v2604_v50, %v2569_v28 }
 0x3c0   :  { %v2523_v29 = vadd.f32 %v2522_v48, %v2496_v9 }
 0x3c2   :  { %v2737_v61 = vsel %vm36_vm0, %v2523_v29, 0.0 }
 0x3c3   :  { %v2738_v30 = vadd.f32 %v2737_v61, %v2736_v17 }
 0x3c5   :  { %v2720_v2 = vpop.f32.mrf.mxu3 }
 0x3c6   :  { %v2693_v4 = vpop.f32.mrf.mxu2  ;;  %v2635_v6 = vpop.f32.mrf.mxu0 }
 0x3c7   :  { %v2660_v31 = vpop.f32.mrf.mxu1  ;;  %v2636_v21 = vadd.f32 %v2635_v6, %v2605_v13 }
 0x3c8   :  { %v2661_v19 = vadd.f32 %v2660_v31, %v2631_v60 }
 0x3ca   :  { %v2694_v42 = vadd.f32 %v2693_v4, %v2661_v19 }
 0x3cc   :  { %v2721_v24 = vadd.f32 %v2720_v2, %v2694_v42 }
 0x3cd   :  { %v2724_v23 = vpop.f32.mrf.mxu3 }
 0x3ce   :  { %v2732_v22 = vsel %vm36_vm0, %v2721_v24, 0.0  ;;  %v2697_v16 = vpop.f32.mrf.mxu2 }
 0x3cf   :  { %v2733_v10 = vadd.f32 %v2732_v22, %v2731_v18  ;;  %v2666_v38 = vpop.f32.mrf.mxu1 }
 0x3d0   :  { %v2667_v14 = vadd.f32 %v2666_v38, %v2636_v21 }
 0x3d1   :  { %v2745_v5 = vadd.f32 %v2772_v20, %v2733_v10 }
 0x3d2   :  { %v2698_v35 = vadd.f32 %v2697_v16, %v2667_v14 }
 0x3d3   :  { %2747 = vst.msk [vmem:[#allocation2] sm:$0xff] %vm36_vm0, %v2745_v5 }
 0x3d4   :  { %v2725_v8 = vadd.f32 %v2724_v23, %v2698_v35 }
 0x3d6   :  { %v2739_v32 = vsel %vm36_vm0, %v2725_v8, 0.0 }
 0x3d7   :  { %v2740_v3 = vadd.f32 %v2739_v32, %v2738_v30 }
 0x3d9   :  { %v2746_v15 = vadd.f32 %v2772_v20, %v2740_v3 }
 0x3db   :  { %2748 = vst.msk [vmem:[#allocation2 + $0x8] sm:$0xff] %vm36_vm0, %v2746_v15 }
 0x3dc   :  { %2761 = dma.vmem_to_hbm [thread:$0]  %s2754_s30, 256, %s2756_s6, [#allocation3], %s2834_s7, %s2834_s7, %s2835_s8  }
 0x3dd   :  { %2829 = dma.done.wait [#allocation3], 256  }
 0x3de   :  { %2830 = vsyncadd [#allocation3], 4294967040 }
 0x3df   :  { %2766 = vsyncpa [#allocation3], 1 }

</bundles_post_ra>
